<compile_context>
chip_gen: v7x
topology: tpu7x:2x2x1
jax: 0.10.0
libtpu: 0.0.40
codegen_flags: <defaults>
</compile_context>

<pallas_src>
import functools
import math

import jax
import jax.numpy as jnp
from jax.experimental import pallas as pl
from jax.experimental.pallas import tpu as pltpu


def _encoder_stack_kernel(
    x_ref,                               # (b_tile, S, D) f32
    wq_ref, bq_ref,                      # (1, H, D, dh) bf16, (1, H, 1, dh) f32
    wk_ref, bk_ref,                      # (1, H, D, dh) bf16, (1, H, 1, dh) f32
    wv_ref, bv_ref,                      # (1, H, D, dh) bf16, (1, H, 1, dh) f32
    wo_ref, bo_ref,                      # (1, H, dh, D) bf16, (1, 1, D) f32
    gamma_ref, beta_ref,                 # (1, 1, D) f32 each (per-layer AddAndNorm affine)
    w1_ref, b1_ref,                      # (1, D, F) bf16, (1, 1, F) f32
    w2_ref, b2_ref,                      # (1, F, D) bf16, (1, 1, D) f32
    o_ref,                               # (b_tile, S, D) f32
    act_ref,                             # VMEM scratch (b_tile*S, D) f32 — carried activation
    *, nheads: int, eps: float = 1e-5,
):
    layer = pl.program_id(1)
    n_layers = pl.num_programs(1)
    Bt, S, D = x_ref.shape
    M = Bt * S
    dh = D // nheads

    # Initialize the carried activation from the kernel input on the first layer.
    @pl.when(layer == 0)
    def _():
        act_ref[...] = x_ref[...].reshape(M, D).astype(jnp.float32)

    gamma = gamma_ref[0]                 # (1, D)
    beta = beta_ref[0]                   # (1, D)

    def layer_norm(v):                   # v: (M, D) f32 ; single-pass variance
        mu = jnp.mean(v, axis=-1, keepdims=True)
        var = jnp.mean(v * v, axis=-1, keepdims=True) - mu * mu
        return (v - mu) * jax.lax.rsqrt(var + eps) * gamma + beta

    x = act_ref[...]                     # (M, D) f32
    xb = x.astype(jnp.bfloat16)

    # ---- Multi-head self-attention -------------------------------------------------
    # Per-head weights are stacked on a leading axis -> no lane slicing / concat.
    # 1/sqrt(dh) is already folded into wq / bq (param prep).
    attn = jnp.zeros((M, D), jnp.float32)
    for h in range(nheads):
        q = jnp.dot(xb, wq_ref[0, h], preferred_element_type=jnp.float32) + bq_ref[0, h]
        k = jnp.dot(xb, wk_ref[0, h], preferred_element_type=jnp.float32) + bk_ref[0, h]
        v = jnp.dot(xb, wv_ref[0, h], preferred_element_type=jnp.float32) + bv_ref[0, h]

        q3 = q.reshape(Bt, S, dh).astype(jnp.bfloat16)   # leading-dim split only
        k3 = k.reshape(Bt, S, dh).astype(jnp.bfloat16)
        v3 = v.reshape(Bt, S, dh).astype(jnp.bfloat16)

        s = jnp.einsum("bqd,bkd->bqk", q3, k3,
                       preferred_element_type=jnp.float32)          # (Bt, S, S)
        s = s - jnp.max(s, axis=-1, keepdims=True)
        p = jnp.exp(s)
        p = p * pl.reciprocal(jnp.sum(p, axis=-1, keepdims=True), approx=True)
        ctx = jnp.einsum("bqk,bkd->bqd", p.astype(jnp.bfloat16), v3,
                         preferred_element_type=jnp.float32)         # (Bt, S, dh)

        # Head merge folded into the output projection (sum of per-head matmuls).
        attn = attn + jnp.dot(ctx.reshape(M, dh).astype(jnp.bfloat16), wo_ref[0, h],
                              preferred_element_type=jnp.float32)
    attn = attn + bo_ref[0]

    # ---- Add & Norm 1 ----
    y = layer_norm(x + attn)

    # ---- FeedForward ----
    h1 = jnp.dot(y.astype(jnp.bfloat16), w1_ref[0],
                 preferred_element_type=jnp.float32) + b1_ref[0]
    h1 = jnp.maximum(h1, 0.0)
    ffn = jnp.dot(h1.astype(jnp.bfloat16), w2_ref[0],
                  preferred_element_type=jnp.float32) + b2_ref[0]

    # ---- Add & Norm 2 (same AddAndNorm module -> same gamma/beta) ----
    z = layer_norm(y + ffn)
    act_ref[...] = z

    @pl.when(layer == n_layers - 1)
    def _():
        o_ref[...] = z.reshape(Bt, S, D).astype(o_ref.dtype)


def transformer_encoder(x, params, *, nheads, b_tile=None):
    """x: (B, S, D) float32.  params: dict of layer-stacked weights (leading axis L)."""
    B, S, D = x.shape
    L, H, _, dh = params["wq"].shape
    assert H == nheads and D == H * dh
    F = params["w1"].shape[-1]

    if b_tile is None:
        b_tile = B
        # v7x megacore: only split the batch across >=2 'parallel' steps when each tile
        # still feeds the MXU full-width (per-grid-step overhead ~0.35us).
        if B % 2 == 0 and (B // 2) * S >= 256:
            b_tile = B // 2
    assert B % b_tile == 0, "batch must divide b_tile evenly (else rows are dropped)"
    n_btiles = B // b_tile

    def layer_spec(arr):
        n_rest = arr.ndim - 1
        return pl.BlockSpec((1,) + tuple(arr.shape[1:]),
                            lambda b, l, n=n_rest: (l,) + (0,) * n)

    # VMEM budget: 2x per-layer weights (double-buffered over the layer axis) + carried
    # activation + x/out blocks + intermediate headroom.  Floor 32 MiB; cap 56 MiB so the
    # request stays inside v7x's 64 MiB physical VMEM (v5e/v6e have 128 MiB physical).
    weight_keys = ("wq", "bq", "wk", "bk", "wv", "bv", "wo", "bo",
                   "gamma", "beta", "w1", "b1", "w2", "b2")
    per_layer_w = sum(params[k].size * params[k].dtype.itemsize // L for k in weight_keys)
    act_bytes = b_tile * S * D * 4
    io_bytes = 2 * 2 * act_bytes
    interm_bytes = 8 * b_tile * S * max(D, F) * 4
    vmem_limit = 2 * per_layer_w + act_bytes + io_bytes + interm_bytes + (2 << 20)
    vmem_limit = int(min(max(vmem_limit, 32 << 20), 56 << 20))

    kernel = functools.partial(_encoder_stack_kernel, nheads=nheads)

    return pl.pallas_call(
        kernel,
        out_shape=jax.ShapeDtypeStruct((B, S, D), x.dtype),
        grid_spec=pltpu.PrefetchScalarGridSpec(
            num_scalar_prefetch=0,
            grid=(n_btiles, L),          # (batch: parallel, layer: arbitrary carry)
            in_specs=[
                pl.BlockSpec((b_tile, S, D), lambda b, l: (b, 0, 0)),
                layer_spec(params["wq"]), layer_spec(params["bq"]),
                layer_spec(params["wk"]), layer_spec(params["bk"]),
                layer_spec(params["wv"]), layer_spec(params["bv"]),
                layer_spec(params["wo"]), layer_spec(params["bo"]),
                layer_spec(params["gamma"]), layer_spec(params["beta"]),
                layer_spec(params["w1"]), layer_spec(params["b1"]),
                layer_spec(params["w2"]), layer_spec(params["b2"]),
            ],
            out_specs=pl.BlockSpec((b_tile, S, D), lambda b, l: (b, 0, 0)),
            scratch_shapes=[pltpu.VMEM((b_tile * S, D), jnp.float32)],
        ),
        compiler_params=pltpu.CompilerParams(
            dimension_semantics=("parallel", "arbitrary"),
            vmem_limit_bytes=vmem_limit,
        ),
    )(
        x,
        params["wq"], params["bq"],
        params["wk"], params["bk"],
        params["wv"], params["bv"],
        params["wo"], params["bo"],
        params["gamma"], params["beta"],
        params["w1"], params["b1"],
        params["w2"], params["b2"],
    )


def _xavier_uniform(key, shape):
    fan_in, fan_out = shape[-2], shape[-1]
    limit = math.sqrt(6.0 / (fan_in + fan_out))
    return jax.random.uniform(key, shape, jnp.float32, -limit, limit)


def init_params(key, n_layers, attn_dim, ffn_dim, nheads):
    """Layer-stacked params.  Q/K/V/O weights are pre-split per head (leading axis),
    the 1/sqrt(dh) attention scale is pre-folded into Wq/bq, MXU weights are bf16."""
    D, F, H = attn_dim, ffn_dim, nheads
    dh = D // H
    keys = jax.random.split(key, 6)
    wq = _xavier_uniform(keys[0], (n_layers, D, D))
    wk = _xavier_uniform(keys[1], (n_layers, D, D))
    wv = _xavier_uniform(keys[2], (n_layers, D, D))
    wo = _xavier_uniform(keys[3], (n_layers, D, D))
    w1 = _xavier_uniform(keys[4], (n_layers, D, F))
    w2 = _xavier_uniform(keys[5], (n_layers, F, D))

    def split_cols(w):   # (L, D, D) -> (L, H, D, dh): head h's output columns
        return jnp.transpose(w.reshape(n_layers, D, H, dh), (0, 2, 1, 3))

    scale = 1.0 / math.sqrt(dh)
    return {
        "wq": (split_cols(wq) * scale).astype(jnp.bfloat16),
        "bq": jnp.zeros((n_layers, H, 1, dh), jnp.float32),     # (pre-scaled; zero here)
        "wk": split_cols(wk).astype(jnp.bfloat16),
        "bk": jnp.zeros((n_layers, H, 1, dh), jnp.float32),
        "wv": split_cols(wv).astype(jnp.bfloat16),
        "bv": jnp.zeros((n_layers, H, 1, dh), jnp.float32),
        "wo": wo.reshape(n_layers, H, dh, D).astype(jnp.bfloat16),   # head h's input rows
        "bo": jnp.zeros((n_layers, 1, D), jnp.float32),
        "gamma": jnp.ones((n_layers, 1, D), jnp.float32),
        "beta": jnp.zeros((n_layers, 1, D), jnp.float32),
        "w1": w1.astype(jnp.bfloat16),
        "b1": jnp.zeros((n_layers, 1, F), jnp.float32),
        "w2": w2.astype(jnp.bfloat16),
        "b2": jnp.zeros((n_layers, 1, D), jnp.float32),
    }


def _ref_forward(x, params):
    """Pure-JAX f32 reference (same per-head weight layout, same folded scale)."""
    B, S, D = x.shape
    L, H, _, dh = params["wq"].shape
    h = x.astype(jnp.float32).reshape(B * S, D)

    def ln(v, g, b, eps=1e-5):
        mu = jnp.mean(v, -1, keepdims=True)
        var = jnp.mean((v - mu) ** 2, -1, keepdims=True)
        return (v - mu) / jnp.sqrt(var + eps) * g + b

    for l in range(L):
        p32 = lambda k: params[k][l].astype(jnp.float32)
        q = jnp.einsum("md,hde->hme", h, p32("wq")) + p32("bq")
        k = jnp.einsum("md,hde->hme", h, p32("wk")) + p32("bk")
        v = jnp.einsum("md,hde->hme", h, p32("wv")) + p32("bv")
        q = q.reshape(H, B, S, dh); k = k.reshape(H, B, S, dh); v = v.reshape(H, B, S, dh)
        s = jnp.einsum("hbqd,hbkd->hbqk", q, k)          # scale already folded into wq
        p = jax.nn.softmax(s, axis=-1)
        ctx = jnp.einsum("hbqk,hbkd->hbqd", p, v).reshape(H, B * S, dh)
        attn = jnp.einsum("hme,hed->md", ctx, p32("wo")) + p32("bo")
        y = ln(h + attn, p32("gamma"), p32("beta"))
        ff = jnp.maximum(y @ p32("w1") + p32("b1"), 0.0) @ p32("w2") + p32("b2")
        h = ln(y + ff, p32("gamma"), p32("beta"))
    return h.reshape(B, S, D)


if __name__ == "__main__":
    # Small shapes consistent with the module: (batch, seq, hidden)
    B, S, D = 2, 8, 32
    NHEADS = 4
    FFN = 64
    N_LAYERS = 6

    key = jax.random.PRNGKey(0)
    kx, kp = jax.random.split(key)
    x = jax.random.normal(kx, (B, S, D), jnp.float32)
    params = init_params(kp, N_LAYERS, D, FFN, NHEADS)

    out = transformer_encoder(x, params, nheads=NHEADS)
    out = jax.block_until_ready(out)
    assert out.shape == (B, S, D) and out.dtype == jnp.float32
    assert bool(jnp.all(jnp.isfinite(out)))

    # Loose-tolerance check vs pure-JAX reference (bf16 MXU inputs + approx reciprocal
    # mean bit-exactness is not expected; structural errors would be O(1)).
    ref = _ref_forward(x, params)
    max_err = float(jnp.max(jnp.abs(out - ref)))
    assert max_err < 0.35, f"mismatch vs reference: max abs err {max_err}"

    print("KERNEL_OK")
</pallas_src>

<mosaic_0001>
module attributes {stable_mosaic.version = 11 : i64} {
  func.func @_encoder_stack_kernel(%arg0: i32, %arg1: i32, %arg2: memref<2x8x32xf32, #tpu.memory_space<vmem>>, %arg3: memref<1x4x32x8xbf16, #tpu.memory_space<vmem>>, %arg4: memref<1x4x1x8xf32, #tpu.memory_space<vmem>>, %arg5: memref<1x4x32x8xbf16, #tpu.memory_space<vmem>>, %arg6: memref<1x4x1x8xf32, #tpu.memory_space<vmem>>, %arg7: memref<1x4x32x8xbf16, #tpu.memory_space<vmem>>, %arg8: memref<1x4x1x8xf32, #tpu.memory_space<vmem>>, %arg9: memref<1x4x8x32xbf16, #tpu.memory_space<vmem>>, %arg10: memref<1x1x32xf32, #tpu.memory_space<vmem>>, %arg11: memref<1x1x32xf32, #tpu.memory_space<vmem>>, %arg12: memref<1x1x32xf32, #tpu.memory_space<vmem>>, %arg13: memref<1x32x64xbf16, #tpu.memory_space<vmem>>, %arg14: memref<1x1x64xf32, #tpu.memory_space<vmem>>, %arg15: memref<1x64x32xbf16, #tpu.memory_space<vmem>>, %arg16: memref<1x1x32xf32, #tpu.memory_space<vmem>>, %arg17: memref<2x8x32xf32, #tpu.memory_space<vmem>>, %arg18: memref<16x32xf32, #tpu.memory_space<vmem>>) attributes {dimension_semantics = [#tpu.dimension_semantics<parallel>, #tpu.dimension_semantics<arbitrary>], iteration_bounds = array<i64: 1, 6>, scalar_prefetch = 0 : i64, scratch_operands = 1 : i64, tpu.core_type = #tpu.core_type<tc>, window_params = [{transform_indices = @transform_0, window_bounds = array<i64: 2, 8, 32>}, {transform_indices = @transform_1, window_bounds = array<i64: 1, 4, 32, 8>}, {transform_indices = @transform_2, window_bounds = array<i64: 1, 4, 1, 8>}, {transform_indices = @transform_3, window_bounds = array<i64: 1, 4, 32, 8>}, {transform_indices = @transform_4, window_bounds = array<i64: 1, 4, 1, 8>}, {transform_indices = @transform_5, window_bounds = array<i64: 1, 4, 32, 8>}, {transform_indices = @transform_6, window_bounds = array<i64: 1, 4, 1, 8>}, {transform_indices = @transform_7, window_bounds = array<i64: 1, 4, 8, 32>}, {transform_indices = @transform_8, window_bounds = array<i64: 1, 1, 32>}, {transform_indices = @transform_9, window_bounds = array<i64: 1, 1, 32>}, {transform_indices = @transform_10, window_bounds = array<i64: 1, 1, 32>}, {transform_indices = @transform_11, window_bounds = array<i64: 1, 32, 64>}, {transform_indices = @transform_12, window_bounds = array<i64: 1, 1, 64>}, {transform_indices = @transform_13, window_bounds = array<i64: 1, 64, 32>}, {transform_indices = @transform_14, window_bounds = array<i64: 1, 1, 32>}, {transform_indices = @transform_15, window_bounds = array<i64: 2, 8, 32>}]} {
    %c0_i32 = arith.constant 0 : i32
    %0 = arith.cmpi eq, %arg1, %c0_i32 : i32
    %1 = arith.extui %0 : i1 to i32
    %c0_i32_0 = arith.constant 0 : i32
    %2 = arith.cmpi ne, %1, %c0_i32_0 : i32
    scf.if %2 {
      %c0_180 = arith.constant 0 : index
      %c0_181 = arith.constant 0 : index
      %c0_182 = arith.constant 0 : index
      %266 = vector.load %arg2[%c0_180, %c0_181, %c0_182] : memref<2x8x32xf32, #tpu.memory_space<vmem>>, vector<2x8x32xf32>
      %267 = vector.shape_cast %266 : vector<2x8x32xf32> to vector<16x32xf32>
      %c0_183 = arith.constant 0 : index
      %c0_184 = arith.constant 0 : index
      %268 = vector.load %arg18[%c0_183, %c0_184] : memref<16x32xf32, #tpu.memory_space<vmem>>, vector<16x32xf32>
      tpu.vector_store %arg18[%c0_183, %c0_184], %267 {strides = array<i32>} : memref<16x32xf32, #tpu.memory_space<vmem>>, vector<16x32xf32>,
    } else {
    }
    %c0 = arith.constant 0 : index
    %c0_1 = arith.constant 0 : index
    %c0_2 = arith.constant 0 : index
    %3 = vector.load %arg11[%c0, %c0_1, %c0_2] : memref<1x1x32xf32, #tpu.memory_space<vmem>>, vector<1x1x32xf32>
    %4 = vector.shape_cast %3 : vector<1x1x32xf32> to vector<1x32xf32>
    %c0_3 = arith.constant 0 : index
    %c0_4 = arith.constant 0 : index
    %c0_5 = arith.constant 0 : index
    %5 = vector.load %arg12[%c0_3, %c0_4, %c0_5] : memref<1x1x32xf32, #tpu.memory_space<vmem>>, vector<1x1x32xf32>
    %6 = vector.shape_cast %5 : vector<1x1x32xf32> to vector<1x32xf32>
    %c0_6 = arith.constant 0 : index
    %c0_7 = arith.constant 0 : index
    %7 = vector.load %arg18[%c0_6, %c0_7] : memref<16x32xf32, #tpu.memory_space<vmem>>, vector<16x32xf32>
    %8 = arith.truncf %7 : vector<16x32xf32> to vector<16x32xbf16>
    %cst = arith.constant 0.000000e+00 : f32
    %9 = vector.broadcast %cst : f32 to vector<16x32xf32>
    %c0_8 = arith.constant 0 : index
    %c0_9 = arith.constant 0 : index
    %c0_10 = arith.constant 0 : index
    %c0_11 = arith.constant 0 : index
    %10 = vector.load %arg3[%c0_8, %c0_9, %c0_10, %c0_11] : memref<1x4x32x8xbf16, #tpu.memory_space<vmem>>, vector<1x1x32x8xbf16>
    %11 = vector.shape_cast %10 : vector<1x1x32x8xbf16> to vector<32x8xbf16>
    %cst_12 = arith.constant dense<0.000000e+00> : vector<16x8xf32>
    %12 = tpu.matmul %8, %11, %cst_12 {dimension_numbers = #tpu.dot_dimension_numbers<[1], [0], [0], [1], [0, 0, 1, 1], [], []>} : vector<16x32xbf16>, vector<32x8xbf16>, vector<16x8xf32> -> vector<16x8xf32>
    %c0_13 = arith.constant 0 : index
    %c0_14 = arith.constant 0 : index
    %c0_15 = arith.constant 0 : index
    %c0_16 = arith.constant 0 : index
    %13 = vector.load %arg4[%c0_13, %c0_14, %c0_15, %c0_16] : memref<1x4x1x8xf32, #tpu.memory_space<vmem>>, vector<1x1x1x8xf32>
    %14 = vector.shape_cast %13 : vector<1x1x1x8xf32> to vector<1x8xf32>
    %15 = vector.broadcast %14 : vector<1x8xf32> to vector<16x8xf32>
    %16 = arith.addf %12, %15 : vector<16x8xf32>
    %c0_17 = arith.constant 0 : index
    %c0_18 = arith.constant 0 : index
    %c0_19 = arith.constant 0 : index
    %c0_20 = arith.constant 0 : index
    %17 = vector.load %arg5[%c0_17, %c0_18, %c0_19, %c0_20] : memref<1x4x32x8xbf16, #tpu.memory_space<vmem>>, vector<1x1x32x8xbf16>
    %18 = vector.shape_cast %17 : vector<1x1x32x8xbf16> to vector<32x8xbf16>
    %cst_21 = arith.constant dense<0.000000e+00> : vector<16x8xf32>
    %19 = tpu.matmul %8, %18, %cst_21 {dimension_numbers = #tpu.dot_dimension_numbers<[1], [0], [0], [1], [0, 0, 1, 1], [], []>} : vector<16x32xbf16>, vector<32x8xbf16>, vector<16x8xf32> -> vector<16x8xf32>
    %c0_22 = arith.constant 0 : index
    %c0_23 = arith.constant 0 : index
    %c0_24 = arith.constant 0 : index
    %c0_25 = arith.constant 0 : index
    %20 = vector.load %arg6[%c0_22, %c0_23, %c0_24, %c0_25] : memref<1x4x1x8xf32, #tpu.memory_space<vmem>>, vector<1x1x1x8xf32>
    %21 = vector.shape_cast %20 : vector<1x1x1x8xf32> to vector<1x8xf32>
    %22 = vector.broadcast %21 : vector<1x8xf32> to vector<16x8xf32>
    %23 = arith.addf %19, %22 : vector<16x8xf32>
    %c0_26 = arith.constant 0 : index
    %c0_27 = arith.constant 0 : index
    %c0_28 = arith.constant 0 : index
    %c0_29 = arith.constant 0 : index
    %24 = vector.load %arg7[%c0_26, %c0_27, %c0_28, %c0_29] : memref<1x4x32x8xbf16, #tpu.memory_space<vmem>>, vector<1x1x32x8xbf16>
    %25 = vector.shape_cast %24 : vector<1x1x32x8xbf16> to vector<32x8xbf16>
    %cst_30 = arith.constant dense<0.000000e+00> : vector<16x8xf32>
    %26 = tpu.matmul %8, %25, %cst_30 {dimension_numbers = #tpu.dot_dimension_numbers<[1], [0], [0], [1], [0, 0, 1, 1], [], []>} : vector<16x32xbf16>, vector<32x8xbf16>, vector<16x8xf32> -> vector<16x8xf32>
    %c0_31 = arith.constant 0 : index
    %c0_32 = arith.constant 0 : index
    %c0_33 = arith.constant 0 : index
    %c0_34 = arith.constant 0 : index
    %27 = vector.load %arg8[%c0_31, %c0_32, %c0_33, %c0_34] : memref<1x4x1x8xf32, #tpu.memory_space<vmem>>, vector<1x1x1x8xf32>
    %28 = vector.shape_cast %27 : vector<1x1x1x8xf32> to vector<1x8xf32>
    %29 = vector.broadcast %28 : vector<1x8xf32> to vector<16x8xf32>
    %30 = arith.addf %26, %29 : vector<16x8xf32>
    %31 = vector.shape_cast %16 : vector<16x8xf32> to vector<2x8x8xf32>
    %32 = arith.truncf %31 : vector<2x8x8xf32> to vector<2x8x8xbf16>
    %33 = vector.shape_cast %23 : vector<16x8xf32> to vector<2x8x8xf32>
    %34 = arith.truncf %33 : vector<2x8x8xf32> to vector<2x8x8xbf16>
    %35 = vector.shape_cast %30 : vector<16x8xf32> to vector<2x8x8xf32>
    %36 = arith.truncf %35 : vector<2x8x8xf32> to vector<2x8x8xbf16>
    "tpu.trace_start"() <{level = 10 : i32, message = "bqd,bkd->bqk"}> : () -> ()
    %cst_35 = arith.constant dense<0.000000e+00> : vector<2x8x8xf32>
    %37 = tpu.matmul %32, %34, %cst_35 {dimension_numbers = #tpu.dot_dimension_numbers<[2], [2], [1], [1], [0, 0, 0, 1, 1, 1], [0], [0]>} : vector<2x8x8xbf16>, vector<2x8x8xbf16>, vector<2x8x8xf32> -> vector<2x8x8xf32>
    "tpu.trace_stop"() : () -> ()
    %cst_36 = arith.constant dense<0xFF800000> : vector<2x8xf32>
    %38 = vector.multi_reduction <maximumf>, %37, %cst_36 [2] : vector<2x8x8xf32> to vector<2x8xf32>
    %39 = vector.shape_cast %38 : vector<2x8xf32> to vector<2x8x1xf32>
    %40 = vector.broadcast %39 : vector<2x8x1xf32> to vector<2x8x8xf32>
    %41 = arith.subf %37, %40 : vector<2x8x8xf32>
    %42 = math.exp %41 : vector<2x8x8xf32>
    %cst_37 = arith.constant dense<0.000000e+00> : vector<2x8xf32>
    %43 = vector.multi_reduction <add>, %42, %cst_37 [2] : vector<2x8x8xf32> to vector<2x8xf32>
    %44 = vector.shape_cast %43 : vector<2x8xf32> to vector<2x8x1xf32>
    %45 = tpu.reciprocal %44 {approx = true} : vector<2x8x1xf32> -> vector<2x8x1xf32>
    %46 = vector.broadcast %45 : vector<2x8x1xf32> to vector<2x8x8xf32>
    %47 = arith.mulf %42, %46 : vector<2x8x8xf32>
    %48 = arith.truncf %47 : vector<2x8x8xf32> to vector<2x8x8xbf16>
    "tpu.trace_start"() <{level = 10 : i32, message = "bqk,bkd->bqd"}> : () -> ()
    %cst_38 = arith.constant dense<0.000000e+00> : vector<2x8x8xf32>
    %49 = tpu.matmul %48, %36, %cst_38 {dimension_numbers = #tpu.dot_dimension_numbers<[2], [1], [1], [2], [0, 0, 0, 1, 1, 2], [0], [0]>} : vector<2x8x8xbf16>, vector<2x8x8xbf16>, vector<2x8x8xf32> -> vector<2x8x8xf32>
    "tpu.trace_stop"() : () -> ()
    %50 = vector.shape_cast %49 : vector<2x8x8xf32> to vector<16x8xf32>
    %51 = arith.truncf %50 : vector<16x8xf32> to vector<16x8xbf16>
    %c0_39 = arith.constant 0 : index
    %c0_40 = arith.constant 0 : index
    %c0_41 = arith.constant 0 : index
    %c0_42 = arith.constant 0 : index
    %52 = vector.load %arg9[%c0_39, %c0_40, %c0_41, %c0_42] : memref<1x4x8x32xbf16, #tpu.memory_space<vmem>>, vector<1x1x8x32xbf16>
    %53 = vector.shape_cast %52 : vector<1x1x8x32xbf16> to vector<8x32xbf16>
    %cst_43 = arith.constant dense<0.000000e+00> : vector<16x32xf32>
    %54 = tpu.matmul %51, %53, %cst_43 {dimension_numbers = #tpu.dot_dimension_numbers<[1], [0], [0], [1], [0, 0, 1, 1], [], []>} : vector<16x8xbf16>, vector<8x32xbf16>, vector<16x32xf32> -> vector<16x32xf32>
    %55 = arith.addf %9, %54 : vector<16x32xf32>
    %c0_44 = arith.constant 0 : index
    %c1 = arith.constant 1 : index
    %c0_45 = arith.constant 0 : index
    %c0_46 = arith.constant 0 : index
    %56 = vector.load %arg3[%c0_44, %c1, %c0_45, %c0_46] : memref<1x4x32x8xbf16, #tpu.memory_space<vmem>>, vector<1x1x32x8xbf16>
    %57 = vector.shape_cast %56 : vector<1x1x32x8xbf16> to vector<32x8xbf16>
    %cst_47 = arith.constant dense<0.000000e+00> : vector<16x8xf32>
    %58 = tpu.matmul %8, %57, %cst_47 {dimension_numbers = #tpu.dot_dimension_numbers<[1], [0], [0], [1], [0, 0, 1, 1], [], []>} : vector<16x32xbf16>, vector<32x8xbf16>, vector<16x8xf32> -> vector<16x8xf32>
    %c0_48 = arith.constant 0 : index
    %c1_49 = arith.constant 1 : index
    %c0_50 = arith.constant 0 : index
    %c0_51 = arith.constant 0 : index
    %59 = vector.load %arg4[%c0_48, %c1_49, %c0_50, %c0_51] : memref<1x4x1x8xf32, #tpu.memory_space<vmem>>, vector<1x1x1x8xf32>
    %60 = vector.shape_cast %59 : vector<1x1x1x8xf32> to vector<1x8xf32>
    %61 = vector.broadcast %60 : vector<1x8xf32> to vector<16x8xf32>
    %62 = arith.addf %58, %61 : vector<16x8xf32>
    %c0_52 = arith.constant 0 : index
    %c1_53 = arith.constant 1 : index
    %c0_54 = arith.constant 0 : index
    %c0_55 = arith.constant 0 : index
    %63 = vector.load %arg5[%c0_52, %c1_53, %c0_54, %c0_55] : memref<1x4x32x8xbf16, #tpu.memory_space<vmem>>, vector<1x1x32x8xbf16>
    %64 = vector.shape_cast %63 : vector<1x1x32x8xbf16> to vector<32x8xbf16>
    %cst_56 = arith.constant dense<0.000000e+00> : vector<16x8xf32>
    %65 = tpu.matmul %8, %64, %cst_56 {dimension_numbers = #tpu.dot_dimension_numbers<[1], [0], [0], [1], [0, 0, 1, 1], [], []>} : vector<16x32xbf16>, vector<32x8xbf16>, vector<16x8xf32> -> vector<16x8xf32>
    %c0_57 = arith.constant 0 : index
    %c1_58 = arith.constant 1 : index
    %c0_59 = arith.constant 0 : index
    %c0_60 = arith.constant 0 : index
    %66 = vector.load %arg6[%c0_57, %c1_58, %c0_59, %c0_60] : memref<1x4x1x8xf32, #tpu.memory_space<vmem>>, vector<1x1x1x8xf32>
    %67 = vector.shape_cast %66 : vector<1x1x1x8xf32> to vector<1x8xf32>
    %68 = vector.broadcast %67 : vector<1x8xf32> to vector<16x8xf32>
    %69 = arith.addf %65, %68 : vector<16x8xf32>
    %c0_61 = arith.constant 0 : index
    %c1_62 = arith.constant 1 : index
    %c0_63 = arith.constant 0 : index
    %c0_64 = arith.constant 0 : index
    %70 = vector.load %arg7[%c0_61, %c1_62, %c0_63, %c0_64] : memref<1x4x32x8xbf16, #tpu.memory_space<vmem>>, vector<1x1x32x8xbf16>
    %71 = vector.shape_cast %70 : vector<1x1x32x8xbf16> to vector<32x8xbf16>
    %cst_65 = arith.constant dense<0.000000e+00> : vector<16x8xf32>
    %72 = tpu.matmul %8, %71, %cst_65 {dimension_numbers = #tpu.dot_dimension_numbers<[1], [0], [0], [1], [0, 0, 1, 1], [], []>} : vector<16x32xbf16>, vector<32x8xbf16>, vector<16x8xf32> -> vector<16x8xf32>
    %c0_66 = arith.constant 0 : index
    %c1_67 = arith.constant 1 : index
    %c0_68 = arith.constant 0 : index
    %c0_69 = arith.constant 0 : index
    %73 = vector.load %arg8[%c0_66, %c1_67, %c0_68, %c0_69] : memref<1x4x1x8xf32, #tpu.memory_space<vmem>>, vector<1x1x1x8xf32>
    %74 = vector.shape_cast %73 : vector<1x1x1x8xf32> to vector<1x8xf32>
    %75 = vector.broadcast %74 : vector<1x8xf32> to vector<16x8xf32>
    %76 = arith.addf %72, %75 : vector<16x8xf32>
    %77 = vector.shape_cast %62 : vector<16x8xf32> to vector<2x8x8xf32>
    %78 = arith.truncf %77 : vector<2x8x8xf32> to vector<2x8x8xbf16>
    %79 = vector.shape_cast %69 : vector<16x8xf32> to vector<2x8x8xf32>
    %80 = arith.truncf %79 : vector<2x8x8xf32> to vector<2x8x8xbf16>
    %81 = vector.shape_cast %76 : vector<16x8xf32> to vector<2x8x8xf32>
    %82 = arith.truncf %81 : vector<2x8x8xf32> to vector<2x8x8xbf16>
    "tpu.trace_start"() <{level = 10 : i32, message = "bqd,bkd->bqk"}> : () -> ()
    %cst_70 = arith.constant dense<0.000000e+00> : vector<2x8x8xf32>
    %83 = tpu.matmul %78, %80, %cst_70 {dimension_numbers = #tpu.dot_dimension_numbers<[2], [2], [1], [1], [0, 0, 0, 1, 1, 1], [0], [0]>} : vector<2x8x8xbf16>, vector<2x8x8xbf16>, vector<2x8x8xf32> -> vector<2x8x8xf32>
    "tpu.trace_stop"() : () -> ()
    %cst_71 = arith.constant dense<0xFF800000> : vector<2x8xf32>
    %84 = vector.multi_reduction <maximumf>, %83, %cst_71 [2] : vector<2x8x8xf32> to vector<2x8xf32>
    %85 = vector.shape_cast %84 : vector<2x8xf32> to vector<2x8x1xf32>
    %86 = vector.broadcast %85 : vector<2x8x1xf32> to vector<2x8x8xf32>
    %87 = arith.subf %83, %86 : vector<2x8x8xf32>
    %88 = math.exp %87 : vector<2x8x8xf32>
    %cst_72 = arith.constant dense<0.000000e+00> : vector<2x8xf32>
    %89 = vector.multi_reduction <add>, %88, %cst_72 [2] : vector<2x8x8xf32> to vector<2x8xf32>
    %90 = vector.shape_cast %89 : vector<2x8xf32> to vector<2x8x1xf32>
    %91 = tpu.reciprocal %90 {approx = true} : vector<2x8x1xf32> -> vector<2x8x1xf32>
    %92 = vector.broadcast %91 : vector<2x8x1xf32> to vector<2x8x8xf32>
    %93 = arith.mulf %88, %92 : vector<2x8x8xf32>
    %94 = arith.truncf %93 : vector<2x8x8xf32> to vector<2x8x8xbf16>
    "tpu.trace_start"() <{level = 10 : i32, message = "bqk,bkd->bqd"}> : () -> ()
    %cst_73 = arith.constant dense<0.000000e+00> : vector<2x8x8xf32>
    %95 = tpu.matmul %94, %82, %cst_73 {dimension_numbers = #tpu.dot_dimension_numbers<[2], [1], [1], [2], [0, 0, 0, 1, 1, 2], [0], [0]>} : vector<2x8x8xbf16>, vector<2x8x8xbf16>, vector<2x8x8xf32> -> vector<2x8x8xf32>
    "tpu.trace_stop"() : () -> ()
    %96 = vector.shape_cast %95 : vector<2x8x8xf32> to vector<16x8xf32>
    %97 = arith.truncf %96 : vector<16x8xf32> to vector<16x8xbf16>
    %c0_74 = arith.constant 0 : index
    %c1_75 = arith.constant 1 : index
    %c0_76 = arith.constant 0 : index
    %c0_77 = arith.constant 0 : index
    %98 = vector.load %arg9[%c0_74, %c1_75, %c0_76, %c0_77] : memref<1x4x8x32xbf16, #tpu.memory_space<vmem>>, vector<1x1x8x32xbf16>
    %99 = vector.shape_cast %98 : vector<1x1x8x32xbf16> to vector<8x32xbf16>
    %cst_78 = arith.constant dense<0.000000e+00> : vector<16x32xf32>
    %100 = tpu.matmul %97, %99, %cst_78 {dimension_numbers = #tpu.dot_dimension_numbers<[1], [0], [0], [1], [0, 0, 1, 1], [], []>} : vector<16x8xbf16>, vector<8x32xbf16>, vector<16x32xf32> -> vector<16x32xf32>
    %101 = arith.addf %55, %100 : vector<16x32xf32>
    %c0_79 = arith.constant 0 : index
    %c2 = arith.constant 2 : index
    %c0_80 = arith.constant 0 : index
    %c0_81 = arith.constant 0 : index
    %102 = vector.load %arg3[%c0_79, %c2, %c0_80, %c0_81] : memref<1x4x32x8xbf16, #tpu.memory_space<vmem>>, vector<1x1x32x8xbf16>
    %103 = vector.shape_cast %102 : vector<1x1x32x8xbf16> to vector<32x8xbf16>
    %cst_82 = arith.constant dense<0.000000e+00> : vector<16x8xf32>
    %104 = tpu.matmul %8, %103, %cst_82 {dimension_numbers = #tpu.dot_dimension_numbers<[1], [0], [0], [1], [0, 0, 1, 1], [], []>} : vector<16x32xbf16>, vector<32x8xbf16>, vector<16x8xf32> -> vector<16x8xf32>
    %c0_83 = arith.constant 0 : index
    %c2_84 = arith.constant 2 : index
    %c0_85 = arith.constant 0 : index
    %c0_86 = arith.constant 0 : index
    %105 = vector.load %arg4[%c0_83, %c2_84, %c0_85, %c0_86] : memref<1x4x1x8xf32, #tpu.memory_space<vmem>>, vector<1x1x1x8xf32>
    %106 = vector.shape_cast %105 : vector<1x1x1x8xf32> to vector<1x8xf32>
    %107 = vector.broadcast %106 : vector<1x8xf32> to vector<16x8xf32>
    %108 = arith.addf %104, %107 : vector<16x8xf32>
    %c0_87 = arith.constant 0 : index
    %c2_88 = arith.constant 2 : index
    %c0_89 = arith.constant 0 : index
    %c0_90 = arith.constant 0 : index
    %109 = vector.load %arg5[%c0_87, %c2_88, %c0_89, %c0_90] : memref<1x4x32x8xbf16, #tpu.memory_space<vmem>>, vector<1x1x32x8xbf16>
    %110 = vector.shape_cast %109 : vector<1x1x32x8xbf16> to vector<32x8xbf16>
    %cst_91 = arith.constant dense<0.000000e+00> : vector<16x8xf32>
    %111 = tpu.matmul %8, %110, %cst_91 {dimension_numbers = #tpu.dot_dimension_numbers<[1], [0], [0], [1], [0, 0, 1, 1], [], []>} : vector<16x32xbf16>, vector<32x8xbf16>, vector<16x8xf32> -> vector<16x8xf32>
    %c0_92 = arith.constant 0 : index
    %c2_93 = arith.constant 2 : index
    %c0_94 = arith.constant 0 : index
    %c0_95 = arith.constant 0 : index
    %112 = vector.load %arg6[%c0_92, %c2_93, %c0_94, %c0_95] : memref<1x4x1x8xf32, #tpu.memory_space<vmem>>, vector<1x1x1x8xf32>
    %113 = vector.shape_cast %112 : vector<1x1x1x8xf32> to vector<1x8xf32>
    %114 = vector.broadcast %113 : vector<1x8xf32> to vector<16x8xf32>
    %115 = arith.addf %111, %114 : vector<16x8xf32>
    %c0_96 = arith.constant 0 : index
    %c2_97 = arith.constant 2 : index
    %c0_98 = arith.constant 0 : index
    %c0_99 = arith.constant 0 : index
    %116 = vector.load %arg7[%c0_96, %c2_97, %c0_98, %c0_99] : memref<1x4x32x8xbf16, #tpu.memory_space<vmem>>, vector<1x1x32x8xbf16>
    %117 = vector.shape_cast %116 : vector<1x1x32x8xbf16> to vector<32x8xbf16>
    %cst_100 = arith.constant dense<0.000000e+00> : vector<16x8xf32>
    %118 = tpu.matmul %8, %117, %cst_100 {dimension_numbers = #tpu.dot_dimension_numbers<[1], [0], [0], [1], [0, 0, 1, 1], [], []>} : vector<16x32xbf16>, vector<32x8xbf16>, vector<16x8xf32> -> vector<16x8xf32>
    %c0_101 = arith.constant 0 : index
    %c2_102 = arith.constant 2 : index
    %c0_103 = arith.constant 0 : index
    %c0_104 = arith.constant 0 : index
    %119 = vector.load %arg8[%c0_101, %c2_102, %c0_103, %c0_104] : memref<1x4x1x8xf32, #tpu.memory_space<vmem>>, vector<1x1x1x8xf32>
    %120 = vector.shape_cast %119 : vector<1x1x1x8xf32> to vector<1x8xf32>
    %121 = vector.broadcast %120 : vector<1x8xf32> to vector<16x8xf32>
    %122 = arith.addf %118, %121 : vector<16x8xf32>
    %123 = vector.shape_cast %108 : vector<16x8xf32> to vector<2x8x8xf32>
    %124 = arith.truncf %123 : vector<2x8x8xf32> to vector<2x8x8xbf16>
    %125 = vector.shape_cast %115 : vector<16x8xf32> to vector<2x8x8xf32>
    %126 = arith.truncf %125 : vector<2x8x8xf32> to vector<2x8x8xbf16>
    %127 = vector.shape_cast %122 : vector<16x8xf32> to vector<2x8x8xf32>
    %128 = arith.truncf %127 : vector<2x8x8xf32> to vector<2x8x8xbf16>
    "tpu.trace_start"() <{level = 10 : i32, message = "bqd,bkd->bqk"}> : () -> ()
    %cst_105 = arith.constant dense<0.000000e+00> : vector<2x8x8xf32>
    %129 = tpu.matmul %124, %126, %cst_105 {dimension_numbers = #tpu.dot_dimension_numbers<[2], [2], [1], [1], [0, 0, 0, 1, 1, 1], [0], [0]>} : vector<2x8x8xbf16>, vector<2x8x8xbf16>, vector<2x8x8xf32> -> vector<2x8x8xf32>
    "tpu.trace_stop"() : () -> ()
    %cst_106 = arith.constant dense<0xFF800000> : vector<2x8xf32>
    %130 = vector.multi_reduction <maximumf>, %129, %cst_106 [2] : vector<2x8x8xf32> to vector<2x8xf32>
    %131 = vector.shape_cast %130 : vector<2x8xf32> to vector<2x8x1xf32>
    %132 = vector.broadcast %131 : vector<2x8x1xf32> to vector<2x8x8xf32>
    %133 = arith.subf %129, %132 : vector<2x8x8xf32>
    %134 = math.exp %133 : vector<2x8x8xf32>
    %cst_107 = arith.constant dense<0.000000e+00> : vector<2x8xf32>
    %135 = vector.multi_reduction <add>, %134, %cst_107 [2] : vector<2x8x8xf32> to vector<2x8xf32>
    %136 = vector.shape_cast %135 : vector<2x8xf32> to vector<2x8x1xf32>
    %137 = tpu.reciprocal %136 {approx = true} : vector<2x8x1xf32> -> vector<2x8x1xf32>
    %138 = vector.broadcast %137 : vector<2x8x1xf32> to vector<2x8x8xf32>
    %139 = arith.mulf %134, %138 : vector<2x8x8xf32>
    %140 = arith.truncf %139 : vector<2x8x8xf32> to vector<2x8x8xbf16>
    "tpu.trace_start"() <{level = 10 : i32, message = "bqk,bkd->bqd"}> : () -> ()
    %cst_108 = arith.constant dense<0.000000e+00> : vector<2x8x8xf32>
    %141 = tpu.matmul %140, %128, %cst_108 {dimension_numbers = #tpu.dot_dimension_numbers<[2], [1], [1], [2], [0, 0, 0, 1, 1, 2], [0], [0]>} : vector<2x8x8xbf16>, vector<2x8x8xbf16>, vector<2x8x8xf32> -> vector<2x8x8xf32>
    "tpu.trace_stop"() : () -> ()
    %142 = vector.shape_cast %141 : vector<2x8x8xf32> to vector<16x8xf32>
    %143 = arith.truncf %142 : vector<16x8xf32> to vector<16x8xbf16>
    %c0_109 = arith.constant 0 : index
    %c2_110 = arith.constant 2 : index
    %c0_111 = arith.constant 0 : index
    %c0_112 = arith.constant 0 : index
    %144 = vector.load %arg9[%c0_109, %c2_110, %c0_111, %c0_112] : memref<1x4x8x32xbf16, #tpu.memory_space<vmem>>, vector<1x1x8x32xbf16>
    %145 = vector.shape_cast %144 : vector<1x1x8x32xbf16> to vector<8x32xbf16>
    %cst_113 = arith.constant dense<0.000000e+00> : vector<16x32xf32>
    %146 = tpu.matmul %143, %145, %cst_113 {dimension_numbers = #tpu.dot_dimension_numbers<[1], [0], [0], [1], [0, 0, 1, 1], [], []>} : vector<16x8xbf16>, vector<8x32xbf16>, vector<16x32xf32> -> vector<16x32xf32>
    %147 = arith.addf %101, %146 : vector<16x32xf32>
    %c0_114 = arith.constant 0 : index
    %c3 = arith.constant 3 : index
    %c0_115 = arith.constant 0 : index
    %c0_116 = arith.constant 0 : index
    %148 = vector.load %arg3[%c0_114, %c3, %c0_115, %c0_116] : memref<1x4x32x8xbf16, #tpu.memory_space<vmem>>, vector<1x1x32x8xbf16>
    %149 = vector.shape_cast %148 : vector<1x1x32x8xbf16> to vector<32x8xbf16>
    %cst_117 = arith.constant dense<0.000000e+00> : vector<16x8xf32>
    %150 = tpu.matmul %8, %149, %cst_117 {dimension_numbers = #tpu.dot_dimension_numbers<[1], [0], [0], [1], [0, 0, 1, 1], [], []>} : vector<16x32xbf16>, vector<32x8xbf16>, vector<16x8xf32> -> vector<16x8xf32>
    %c0_118 = arith.constant 0 : index
    %c3_119 = arith.constant 3 : index
    %c0_120 = arith.constant 0 : index
    %c0_121 = arith.constant 0 : index
    %151 = vector.load %arg4[%c0_118, %c3_119, %c0_120, %c0_121] : memref<1x4x1x8xf32, #tpu.memory_space<vmem>>, vector<1x1x1x8xf32>
    %152 = vector.shape_cast %151 : vector<1x1x1x8xf32> to vector<1x8xf32>
    %153 = vector.broadcast %152 : vector<1x8xf32> to vector<16x8xf32>
    %154 = arith.addf %150, %153 : vector<16x8xf32>
    %c0_122 = arith.constant 0 : index
    %c3_123 = arith.constant 3 : index
    %c0_124 = arith.constant 0 : index
    %c0_125 = arith.constant 0 : index
    %155 = vector.load %arg5[%c0_122, %c3_123, %c0_124, %c0_125] : memref<1x4x32x8xbf16, #tpu.memory_space<vmem>>, vector<1x1x32x8xbf16>
    %156 = vector.shape_cast %155 : vector<1x1x32x8xbf16> to vector<32x8xbf16>
    %cst_126 = arith.constant dense<0.000000e+00> : vector<16x8xf32>
    %157 = tpu.matmul %8, %156, %cst_126 {dimension_numbers = #tpu.dot_dimension_numbers<[1], [0], [0], [1], [0, 0, 1, 1], [], []>} : vector<16x32xbf16>, vector<32x8xbf16>, vector<16x8xf32> -> vector<16x8xf32>
    %c0_127 = arith.constant 0 : index
    %c3_128 = arith.constant 3 : index
    %c0_129 = arith.constant 0 : index
    %c0_130 = arith.constant 0 : index
    %158 = vector.load %arg6[%c0_127, %c3_128, %c0_129, %c0_130] : memref<1x4x1x8xf32, #tpu.memory_space<vmem>>, vector<1x1x1x8xf32>
    %159 = vector.shape_cast %158 : vector<1x1x1x8xf32> to vector<1x8xf32>
    %160 = vector.broadcast %159 : vector<1x8xf32> to vector<16x8xf32>
    %161 = arith.addf %157, %160 : vector<16x8xf32>
    %c0_131 = arith.constant 0 : index
    %c3_132 = arith.constant 3 : index
    %c0_133 = arith.constant 0 : index
    %c0_134 = arith.constant 0 : index
    %162 = vector.load %arg7[%c0_131, %c3_132, %c0_133, %c0_134] : memref<1x4x32x8xbf16, #tpu.memory_space<vmem>>, vector<1x1x32x8xbf16>
    %163 = vector.shape_cast %162 : vector<1x1x32x8xbf16> to vector<32x8xbf16>
    %cst_135 = arith.constant dense<0.000000e+00> : vector<16x8xf32>
    %164 = tpu.matmul %8, %163, %cst_135 {dimension_numbers = #tpu.dot_dimension_numbers<[1], [0], [0], [1], [0, 0, 1, 1], [], []>} : vector<16x32xbf16>, vector<32x8xbf16>, vector<16x8xf32> -> vector<16x8xf32>
    %c0_136 = arith.constant 0 : index
    %c3_137 = arith.constant 3 : index
    %c0_138 = arith.constant 0 : index
    %c0_139 = arith.constant 0 : index
    %165 = vector.load %arg8[%c0_136, %c3_137, %c0_138, %c0_139] : memref<1x4x1x8xf32, #tpu.memory_space<vmem>>, vector<1x1x1x8xf32>
    %166 = vector.shape_cast %165 : vector<1x1x1x8xf32> to vector<1x8xf32>
    %167 = vector.broadcast %166 : vector<1x8xf32> to vector<16x8xf32>
    %168 = arith.addf %164, %167 : vector<16x8xf32>
    %169 = vector.shape_cast %154 : vector<16x8xf32> to vector<2x8x8xf32>
    %170 = arith.truncf %169 : vector<2x8x8xf32> to vector<2x8x8xbf16>
    %171 = vector.shape_cast %161 : vector<16x8xf32> to vector<2x8x8xf32>
    %172 = arith.truncf %171 : vector<2x8x8xf32> to vector<2x8x8xbf16>
    %173 = vector.shape_cast %168 : vector<16x8xf32> to vector<2x8x8xf32>
    %174 = arith.truncf %173 : vector<2x8x8xf32> to vector<2x8x8xbf16>
    "tpu.trace_start"() <{level = 10 : i32, message = "bqd,bkd->bqk"}> : () -> ()
    %cst_140 = arith.constant dense<0.000000e+00> : vector<2x8x8xf32>
    %175 = tpu.matmul %170, %172, %cst_140 {dimension_numbers = #tpu.dot_dimension_numbers<[2], [2], [1], [1], [0, 0, 0, 1, 1, 1], [0], [0]>} : vector<2x8x8xbf16>, vector<2x8x8xbf16>, vector<2x8x8xf32> -> vector<2x8x8xf32>
    "tpu.trace_stop"() : () -> ()
    %cst_141 = arith.constant dense<0xFF800000> : vector<2x8xf32>
    %176 = vector.multi_reduction <maximumf>, %175, %cst_141 [2] : vector<2x8x8xf32> to vector<2x8xf32>
    %177 = vector.shape_cast %176 : vector<2x8xf32> to vector<2x8x1xf32>
    %178 = vector.broadcast %177 : vector<2x8x1xf32> to vector<2x8x8xf32>
    %179 = arith.subf %175, %178 : vector<2x8x8xf32>
    %180 = math.exp %179 : vector<2x8x8xf32>
    %cst_142 = arith.constant dense<0.000000e+00> : vector<2x8xf32>
    %181 = vector.multi_reduction <add>, %180, %cst_142 [2] : vector<2x8x8xf32> to vector<2x8xf32>
    %182 = vector.shape_cast %181 : vector<2x8xf32> to vector<2x8x1xf32>
    %183 = tpu.reciprocal %182 {approx = true} : vector<2x8x1xf32> -> vector<2x8x1xf32>
    %184 = vector.broadcast %183 : vector<2x8x1xf32> to vector<2x8x8xf32>
    %185 = arith.mulf %180, %184 : vector<2x8x8xf32>
    %186 = arith.truncf %185 : vector<2x8x8xf32> to vector<2x8x8xbf16>
    "tpu.trace_start"() <{level = 10 : i32, message = "bqk,bkd->bqd"}> : () -> ()
    %cst_143 = arith.constant dense<0.000000e+00> : vector<2x8x8xf32>
    %187 = tpu.matmul %186, %174, %cst_143 {dimension_numbers = #tpu.dot_dimension_numbers<[2], [1], [1], [2], [0, 0, 0, 1, 1, 2], [0], [0]>} : vector<2x8x8xbf16>, vector<2x8x8xbf16>, vector<2x8x8xf32> -> vector<2x8x8xf32>
    "tpu.trace_stop"() : () -> ()
    %188 = vector.shape_cast %187 : vector<2x8x8xf32> to vector<16x8xf32>
    %189 = arith.truncf %188 : vector<16x8xf32> to vector<16x8xbf16>
    %c0_144 = arith.constant 0 : index
    %c3_145 = arith.constant 3 : index
    %c0_146 = arith.constant 0 : index
    %c0_147 = arith.constant 0 : index
    %190 = vector.load %arg9[%c0_144, %c3_145, %c0_146, %c0_147] : memref<1x4x8x32xbf16, #tpu.memory_space<vmem>>, vector<1x1x8x32xbf16>
    %191 = vector.shape_cast %190 : vector<1x1x8x32xbf16> to vector<8x32xbf16>
    %cst_148 = arith.constant dense<0.000000e+00> : vector<16x32xf32>
    %192 = tpu.matmul %189, %191, %cst_148 {dimension_numbers = #tpu.dot_dimension_numbers<[1], [0], [0], [1], [0, 0, 1, 1], [], []>} : vector<16x8xbf16>, vector<8x32xbf16>, vector<16x32xf32> -> vector<16x32xf32>
    %193 = arith.addf %147, %192 : vector<16x32xf32>
    %c0_149 = arith.constant 0 : index
    %c0_150 = arith.constant 0 : index
    %c0_151 = arith.constant 0 : index
    %194 = vector.load %arg10[%c0_149, %c0_150, %c0_151] : memref<1x1x32xf32, #tpu.memory_space<vmem>>, vector<1x1x32xf32>
    %195 = vector.shape_cast %194 : vector<1x1x32xf32> to vector<1x32xf32>
    %196 = vector.broadcast %195 : vector<1x32xf32> to vector<16x32xf32>
    %197 = arith.addf %193, %196 : vector<16x32xf32>
    %198 = arith.addf %7, %197 : vector<16x32xf32>
    %cst_152 = arith.constant dense<0.000000e+00> : vector<16xf32>
    %199 = vector.multi_reduction <add>, %198, %cst_152 [1] : vector<16x32xf32> to vector<16xf32>
    %200 = vector.shape_cast %199 : vector<16xf32> to vector<16x1xf32>
    %cst_153 = arith.constant 3.200000e+01 : f32
    %201 = vector.broadcast %cst_153 : f32 to vector<16x1xf32>
    %202 = arith.divf %200, %201 : vector<16x1xf32>
    %203 = arith.mulf %198, %198 : vector<16x32xf32>
    %cst_154 = arith.constant dense<0.000000e+00> : vector<16xf32>
    %204 = vector.multi_reduction <add>, %203, %cst_154 [1] : vector<16x32xf32> to vector<16xf32>
    %205 = vector.shape_cast %204 : vector<16xf32> to vector<16x1xf32>
    %cst_155 = arith.constant 3.200000e+01 : f32
    %206 = vector.broadcast %cst_155 : f32 to vector<16x1xf32>
    %207 = arith.divf %205, %206 : vector<16x1xf32>
    %208 = arith.mulf %202, %202 : vector<16x1xf32>
    %209 = arith.subf %207, %208 : vector<16x1xf32>
    %210 = vector.broadcast %202 : vector<16x1xf32> to vector<16x32xf32>
    %211 = arith.subf %198, %210 : vector<16x32xf32>
    %cst_156 = arith.constant 9.99999974E-6 : f32
    %212 = vector.broadcast %cst_156 : f32 to vector<16x1xf32>
    %213 = arith.addf %209, %212 : vector<16x1xf32>
    %214 = math.rsqrt %213 : vector<16x1xf32>
    %215 = vector.broadcast %214 : vector<16x1xf32> to vector<16x32xf32>
    %216 = arith.mulf %211, %215 : vector<16x32xf32>
    %217 = vector.broadcast %4 : vector<1x32xf32> to vector<16x32xf32>
    %218 = arith.mulf %216, %217 : vector<16x32xf32>
    %219 = vector.broadcast %6 : vector<1x32xf32> to vector<16x32xf32>
    %220 = arith.addf %218, %219 : vector<16x32xf32>
    %221 = arith.truncf %220 : vector<16x32xf32> to vector<16x32xbf16>
    %c0_157 = arith.constant 0 : index
    %c0_158 = arith.constant 0 : index
    %c0_159 = arith.constant 0 : index
    %222 = vector.load %arg13[%c0_157, %c0_158, %c0_159] : memref<1x32x64xbf16, #tpu.memory_space<vmem>>, vector<1x32x64xbf16>
    %223 = vector.shape_cast %222 : vector<1x32x64xbf16> to vector<32x64xbf16>
    %cst_160 = arith.constant dense<0.000000e+00> : vector<16x64xf32>
    %224 = tpu.matmul %221, %223, %cst_160 {dimension_numbers = #tpu.dot_dimension_numbers<[1], [0], [0], [1], [0, 0, 1, 1], [], []>} : vector<16x32xbf16>, vector<32x64xbf16>, vector<16x64xf32> -> vector<16x64xf32>
    %c0_161 = arith.constant 0 : index
    %c0_162 = arith.constant 0 : index
    %c0_163 = arith.constant 0 : index
    %225 = vector.load %arg14[%c0_161, %c0_162, %c0_163] : memref<1x1x64xf32, #tpu.memory_space<vmem>>, vector<1x1x64xf32>
    %226 = vector.shape_cast %225 : vector<1x1x64xf32> to vector<1x64xf32>
    %227 = vector.broadcast %226 : vector<1x64xf32> to vector<16x64xf32>
    %228 = arith.addf %224, %227 : vector<16x64xf32>
    %cst_164 = arith.constant 0.000000e+00 : f32
    %229 = vector.broadcast %cst_164 : f32 to vector<16x64xf32>
    %230 = arith.maximumf %228, %229 : vector<16x64xf32>
    %231 = arith.truncf %230 : vector<16x64xf32> to vector<16x64xbf16>
    %c0_165 = arith.constant 0 : index
    %c0_166 = arith.constant 0 : index
    %c0_167 = arith.constant 0 : index
    %232 = vector.load %arg15[%c0_165, %c0_166, %c0_167] : memref<1x64x32xbf16, #tpu.memory_space<vmem>>, vector<1x64x32xbf16>
    %233 = vector.shape_cast %232 : vector<1x64x32xbf16> to vector<64x32xbf16>
    %cst_168 = arith.constant dense<0.000000e+00> : vector<16x32xf32>
    %234 = tpu.matmul %231, %233, %cst_168 {dimension_numbers = #tpu.dot_dimension_numbers<[1], [0], [0], [1], [0, 0, 1, 1], [], []>} : vector<16x64xbf16>, vector<64x32xbf16>, vector<16x32xf32> -> vector<16x32xf32>
    %c0_169 = arith.constant 0 : index
    %c0_170 = arith.constant 0 : index
    %c0_171 = arith.constant 0 : index
    %235 = vector.load %arg16[%c0_169, %c0_170, %c0_171] : memref<1x1x32xf32, #tpu.memory_space<vmem>>, vector<1x1x32xf32>
    %236 = vector.shape_cast %235 : vector<1x1x32xf32> to vector<1x32xf32>
    %237 = vector.broadcast %236 : vector<1x32xf32> to vector<16x32xf32>
    %238 = arith.addf %234, %237 : vector<16x32xf32>
    %239 = arith.addf %220, %238 : vector<16x32xf32>
    %cst_172 = arith.constant dense<0.000000e+00> : vector<16xf32>
    %240 = vector.multi_reduction <add>, %239, %cst_172 [1] : vector<16x32xf32> to vector<16xf32>
    %241 = vector.shape_cast %240 : vector<16xf32> to vector<16x1xf32>
    %cst_173 = arith.constant 3.200000e+01 : f32
    %242 = vector.broadcast %cst_173 : f32 to vector<16x1xf32>
    %243 = arith.divf %241, %242 : vector<16x1xf32>
    %244 = arith.mulf %239, %239 : vector<16x32xf32>
    %cst_174 = arith.constant dense<0.000000e+00> : vector<16xf32>
    %245 = vector.multi_reduction <add>, %244, %cst_174 [1] : vector<16x32xf32> to vector<16xf32>
    %246 = vector.shape_cast %245 : vector<16xf32> to vector<16x1xf32>
    %cst_175 = arith.constant 3.200000e+01 : f32
    %247 = vector.broadcast %cst_175 : f32 to vector<16x1xf32>
    %248 = arith.divf %246, %247 : vector<16x1xf32>
    %249 = arith.mulf %243, %243 : vector<16x1xf32>
    %250 = arith.subf %248, %249 : vector<16x1xf32>
    %251 = vector.broadcast %243 : vector<16x1xf32> to vector<16x32xf32>
    %252 = arith.subf %239, %251 : vector<16x32xf32>
    %cst_176 = arith.constant 9.99999974E-6 : f32
    %253 = vector.broadcast %cst_176 : f32 to vector<16x1xf32>
    %254 = arith.addf %250, %253 : vector<16x1xf32>
    %255 = math.rsqrt %254 : vector<16x1xf32>
    %256 = vector.broadcast %255 : vector<16x1xf32> to vector<16x32xf32>
    %257 = arith.mulf %252, %256 : vector<16x32xf32>
    %258 = vector.broadcast %4 : vector<1x32xf32> to vector<16x32xf32>
    %259 = arith.mulf %257, %258 : vector<16x32xf32>
    %260 = vector.broadcast %6 : vector<1x32xf32> to vector<16x32xf32>
    %261 = arith.addf %259, %260 : vector<16x32xf32>
    %c0_177 = arith.constant 0 : index
    %c0_178 = arith.constant 0 : index
    %262 = vector.load %arg18[%c0_177, %c0_178] : memref<16x32xf32, #tpu.memory_space<vmem>>, vector<16x32xf32>
    tpu.vector_store %arg18[%c0_177, %c0_178], %261 {strides = array<i32>} : memref<16x32xf32, #tpu.memory_space<vmem>>, vector<16x32xf32>,
    %c5_i32 = arith.constant 5 : i32
    %263 = arith.cmpi eq, %arg1, %c5_i32 : i32
    %264 = arith.extui %263 : i1 to i32
    %c0_i32_179 = arith.constant 0 : i32
    %265 = arith.cmpi ne, %264, %c0_i32_179 : i32
    scf.if %265 {
      %266 = vector.shape_cast %261 : vector<16x32xf32> to vector<2x8x32xf32>
      %c0_180 = arith.constant 0 : index
      %c0_181 = arith.constant 0 : index
      %c0_182 = arith.constant 0 : index
      %267 = vector.load %arg17[%c0_180, %c0_181, %c0_182] : memref<2x8x32xf32, #tpu.memory_space<vmem>>, vector<2x8x32xf32>
      tpu.vector_store %arg17[%c0_180, %c0_181, %c0_182], %266 {strides = array<i32>} : memref<2x8x32xf32, #tpu.memory_space<vmem>>, vector<2x8x32xf32>,
    } else {
    }
    return
  }
  func.func @transform_0(%arg0: i32, %arg1: i32) -> (i32, i32, i32) {
    %c0_i32 = arith.constant 0 : i32
    %c0_i32_0 = arith.constant 0 : i32
    %c0_i32_1 = arith.constant 0 : i32
    return %arg0, %c0_i32, %c0_i32_0 : i32, i32, i32
  }
  func.func @transform_1(%arg0: i32, %arg1: i32) -> (i32, i32, i32, i32) {
    %c0_i32 = arith.constant 0 : i32
    %c0_i32_0 = arith.constant 0 : i32
    %c0_i32_1 = arith.constant 0 : i32
    %c0_i32_2 = arith.constant 0 : i32
    return %arg1, %c0_i32, %c0_i32_0, %c0_i32_1 : i32, i32, i32, i32
  }
  func.func @transform_2(%arg0: i32, %arg1: i32) -> (i32, i32, i32, i32) {
    %c0_i32 = arith.constant 0 : i32
    %c0_i32_0 = arith.constant 0 : i32
    %c0_i32_1 = arith.constant 0 : i32
    %c0_i32_2 = arith.constant 0 : i32
    return %arg1, %c0_i32, %c0_i32_0, %c0_i32_1 : i32, i32, i32, i32
  }
  func.func @transform_3(%arg0: i32, %arg1: i32) -> (i32, i32, i32, i32) {
    %c0_i32 = arith.constant 0 : i32
    %c0_i32_0 = arith.constant 0 : i32
    %c0_i32_1 = arith.constant 0 : i32
    %c0_i32_2 = arith.constant 0 : i32
    return %arg1, %c0_i32, %c0_i32_0, %c0_i32_1 : i32, i32, i32, i32
  }
  func.func @transform_4(%arg0: i32, %arg1: i32) -> (i32, i32, i32, i32) {
    %c0_i32 = arith.constant 0 : i32
    %c0_i32_0 = arith.constant 0 : i32
    %c0_i32_1 = arith.constant 0 : i32
    %c0_i32_2 = arith.constant 0 : i32
    return %arg1, %c0_i32, %c0_i32_0, %c0_i32_1 : i32, i32, i32, i32
  }
  func.func @transform_5(%arg0: i32, %arg1: i32) -> (i32, i32, i32, i32) {
    %c0_i32 = arith.constant 0 : i32
    %c0_i32_0 = arith.constant 0 : i32
    %c0_i32_1 = arith.constant 0 : i32
    %c0_i32_2 = arith.constant 0 : i32
    return %arg1, %c0_i32, %c0_i32_0, %c0_i32_1 : i32, i32, i32, i32
  }
  func.func @transform_6(%arg0: i32, %arg1: i32) -> (i32, i32, i32, i32) {
    %c0_i32 = arith.constant 0 : i32
    %c0_i32_0 = arith.constant 0 : i32
    %c0_i32_1 = arith.constant 0 : i32
    %c0_i32_2 = arith.constant 0 : i32
    return %arg1, %c0_i32, %c0_i32_0, %c0_i32_1 : i32, i32, i32, i32
  }
  func.func @transform_7(%arg0: i32, %arg1: i32) -> (i32, i32, i32, i32) {
    %c0_i32 = arith.constant 0 : i32
    %c0_i32_0 = arith.constant 0 : i32
    %c0_i32_1 = arith.constant 0 : i32
    %c0_i32_2 = arith.constant 0 : i32
    return %arg1, %c0_i32, %c0_i32_0, %c0_i32_1 : i32, i32, i32, i32
  }
  func.func @transform_8(%arg0: i32, %arg1: i32) -> (i32, i32, i32) {
    %c0_i32 = arith.constant 0 : i32
    %c0_i32_0 = arith.constant 0 : i32
    %c0_i32_1 = arith.constant 0 : i32
    return %arg1, %c0_i32, %c0_i32_0 : i32, i32, i32
  }
  func.func @transform_9(%arg0: i32, %arg1: i32) -> (i32, i32, i32) {
    %c0_i32 = arith.constant 0 : i32
    %c0_i32_0 = arith.constant 0 : i32
    %c0_i32_1 = arith.constant 0 : i32
    return %arg1, %c0_i32, %c0_i32_0 : i32, i32, i32
  }
  func.func @transform_10(%arg0: i32, %arg1: i32) -> (i32, i32, i32) {
    %c0_i32 = arith.constant 0 : i32
    %c0_i32_0 = arith.constant 0 : i32
    %c0_i32_1 = arith.constant 0 : i32
    return %arg1, %c0_i32, %c0_i32_0 : i32, i32, i32
  }
  func.func @transform_11(%arg0: i32, %arg1: i32) -> (i32, i32, i32) {
    %c0_i32 = arith.constant 0 : i32
    %c0_i32_0 = arith.constant 0 : i32
    %c0_i32_1 = arith.constant 0 : i32
    return %arg1, %c0_i32, %c0_i32_0 : i32, i32, i32
  }
  func.func @transform_12(%arg0: i32, %arg1: i32) -> (i32, i32, i32) {
    %c0_i32 = arith.constant 0 : i32
    %c0_i32_0 = arith.constant 0 : i32
    %c0_i32_1 = arith.constant 0 : i32
    return %arg1, %c0_i32, %c0_i32_0 : i32, i32, i32
  }
  func.func @transform_13(%arg0: i32, %arg1: i32) -> (i32, i32, i32) {
    %c0_i32 = arith.constant 0 : i32
    %c0_i32_0 = arith.constant 0 : i32
    %c0_i32_1 = arith.constant 0 : i32
    return %arg1, %c0_i32, %c0_i32_0 : i32, i32, i32
  }
  func.func @transform_14(%arg0: i32, %arg1: i32) -> (i32, i32, i32) {
    %c0_i32 = arith.constant 0 : i32
    %c0_i32_0 = arith.constant 0 : i32
    %c0_i32_1 = arith.constant 0 : i32
    return %arg1, %c0_i32, %c0_i32_0 : i32, i32, i32
  }
  func.func @transform_15(%arg0: i32, %arg1: i32) -> (i32, i32, i32) {
    %c0_i32 = arith.constant 0 : i32
    %c0_i32_0 = arith.constant 0 : i32
    %c0_i32_1 = arith.constant 0 : i32
    return %arg0, %c0_i32, %c0_i32_0 : i32, i32, i32
  }
}

</mosaic_0001>

<bundles_post_ra>
// kernel: tpu_custom_call.1
= control target key start
LH: loop header
LB: loop body
LE: loop exit
PB: predicated region body
PF: predicated region fallthrough
CT: control target
= control target key end

     0   :  { %s4266_s0 = inlined_call_operand.vmem [shape: f32[2,8,32], index: 0, kind: input, shape index: {}]   ;;  %s4267_s1 = inlined_call_operand.vmem [shape: bf16[6,4,32,8], index: 1, kind: input, shape index: {}]   ;;  %s4268_s2 = inlined_call_operand.vmem [shape: f32[6,4,1,8], index: 2, kind: input, shape index: {}]   ;;  %s4269_s3 = inlined_call_operand.vmem [shape: bf16[6,4,32,8], index: 3, kind: input, shape index: {}]   ;;  %s4270_s4 = inlined_call_operand.vmem [shape: f32[6,4,1,8], index: 4, kind: input, shape index: {}]   ;;  %s4271_s5 = inlined_call_operand.vmem [shape: bf16[6,4,32,8], index: 5, kind: input, shape index: {}]   ;;  %s4272_s6 = inlined_call_operand.vmem [shape: f32[6,4,1,8], index: 6, kind: input, shape index: {}]   ;;  %s4273_s7 = inlined_call_operand.vmem [shape: bf16[6,4,8,32], index: 7, kind: input, shape index: {}]   ;;  %s4274_s8 = inlined_call_operand.vmem [shape: f32[6,1,32], index: 8, kind: input, shape index: {}]   ;;  %s4275_s9 = inlined_call_operand.vmem [shape: f32[6,1,32], index: 9, kind: input, shape index: {}]   ;;  %s4276_s10 = inlined_call_operand.vmem [shape: f32[6,1,32], index: 10, kind: input, shape index: {}]   ;;  %s4277_s11 = inlined_call_operand.vmem [shape: bf16[6,32,64], index: 11, kind: input, shape index: {}]   ;;  %s4278_s12 = inlined_call_operand.vmem [shape: f32[6,1,64], index: 12, kind: input, shape index: {}]   ;;  %s4279_s13 = inlined_call_operand.vmem [shape: bf16[6,64,32], index: 13, kind: input, shape index: {}]   ;;  %s4280_s14 = inlined_call_operand.vmem [shape: f32[6,1,32], index: 14, kind: input, shape index: {}]   ;;  %s4281_s15 = inlined_call_operand.hbm [shape: f32[2,8,32], index: 15, kind: output, shape index: {}]  }
   0x1   :  { %4288 = sst [smem:[#allocation11_spill]] %s4266_s0 }
   0x2   :  { %4289 = sst [smem:[#allocation12_spill]] %s4267_s1 }
   0x3   :  { %4290 = sst [smem:[#allocation13_spill]] %s4268_s2 }
   0x4   :  { %4291 = sst [smem:[#allocation14_spill]] %s4269_s3 }
   0x5   :  { %4292 = sst [smem:[#allocation15_spill]] %s4270_s4 }
   0x6   :  { %4293 = sst [smem:[#allocation16_spill]] %s4271_s5 }
   0x7   :  { %4294 = sst [smem:[#allocation17_spill]] %s4272_s6 }
   0x8   :  { %4295 = sst [smem:[#allocation18_spill]] %s4273_s7 }
   0x9   :  { %4296 = sst [smem:[#allocation19_spill]] %s4281_s15 }
   0xa   :  { %20 = vsyncpa [#allocation4], 0  ;;  %s3810_s18 = smov 0   ;;  %s3812_s19 = smov 0  }
   0xb   :  { %s3814_s20 = smov 0  }
   0xc LB: > { %4297 = sst [smem:[#allocation6_spill]] %s3719_s19  ;;  %s35_s22 = sadd.s32 1, %s3719_s19  ;;  %s3723_s20 = sphi %s3814_s20, %s26_s20   ;;  %s3719_s19 = sphi %s3812_s19, %s4319_s19   ;;  %s3715_s18 = sphi %s3810_s18, %s4318_s18  }
   0xd   : > { %4298 = sst [smem:[#allocation7_spill]] %s3723_s20  ;;  %p36_p0 = scmp.ge.s32.totalorder %s35_s22, 6 }
   0xe   : > { %p3087_p1 = scmp.ge.s32.totalorder %s3723_s20, 1  ;;  %p578_p2 = scmp.lt.s32.totalorder %s3723_s20, 7 }
   0xf   : > { %s4321_s22 = smov (%p36_p0, %s35_s22), 0 }
  0x10   : > { %4299 = sst [smem:[#allocation8_spill]] %s4321_s22  ;;  %p579_p3 = pnand %p3087_p1, %p578_p2 }
  0x12   : > { %582 = sbr.rel (%p579_p3) target bundleno = 4769 (0x12a1), region = 80 }
  0x19   : > { %p684_p4 = scmp.lt.s32.totalorder %s3715_s18, 5  ;;  %s4300_s1 = sld [smem:[#allocation12_spill]] }
  0x1a   : > { %s4302_s2 = sld [smem:[#allocation13_spill]]  ;;  %s4304_s3 = sld [smem:[#allocation14_spill]] }
  0x1b   : > { %s3833_s23 = scalar_select %p684_p4, %s3715_s18, 5 }
  0x1c   : > { %s4305_s4 = sld [smem:[#allocation15_spill]]  ;;  %s4306_s5 = sld [smem:[#allocation16_spill]] }
  0x1d   : > { %s3238_s24 = sshll.u32 %s3833_s23, 6  ;;  %s3090_s25 = sshll.u32 %s3833_s23, 2 }
  0x1e   : > { %s4307_s6 = sld [smem:[#allocation17_spill]]  ;;  %s3241_s30 = sshll.u32 %s3833_s23, 4 }
  0x1f   : > { %s3840_s28 = scalar_lea.vmem %s4300_s1, %s3238_s24  ;;  %s4308_s7 = sld [smem:[#allocation18_spill]] }
  0x20   : > { %4301 = sst [smem:[#allocation9_spill]] %s3840_s28  ;;  %s3845_s16 = scalar_lea.vmem %s4302_s2, %s3090_s25 }
  0x21   : > { %4303 = sst [smem:[#allocation10_spill]] %s3845_s16  ;;  %s3850_s22 = scalar_lea.vmem %s4304_s3, %s3238_s24 }
  0x22   : > { %s3855_s20 = scalar_lea.vmem %s4305_s4, %s3090_s25  ;;  %s3860_s27 = scalar_lea.vmem %s4306_s5, %s3238_s24 }
  0x23   : > { %s721_s0 = scalar_lea.vmem %s4275_s9, %s3833_s23  ;;  %s724_s1 = scalar_lea.vmem %s4276_s10, %s3833_s23 }
  0x24   : > { %s3865_s29 = scalar_lea.vmem %s4307_s6, %s3090_s25  ;;  %s3888_s5 = scalar_lea.vmem %s4277_s11, %s3241_s30 }
  0x25   : > { %s3875_s15 = scalar_lea.vmem %s4308_s7, %s3241_s30  ;;  %s732_s17 = scalar_lea.vmem %s4278_s12, %s3833_s23 }
  0x26   : > { %s3243_s3 = sshll.u32 %s3833_s23, 5  ;;  %s740_s24 = scalar_lea.vmem %s4280_s14, %s3833_s23 }
  0x27   : > { %s3898_s7 = scalar_lea.vmem %s4279_s13, %s3243_s3  ;;  %p3103_p5 = scmp.ne.s32.totalorder %s3715_s18, 0 }
  0x28   : > { %s4309_s25 = sld [smem:[#allocation11_spill]] (!%p3103_p5)  ;;  %vm749_vm0 = vcmask (!%p3103_p5), 261120  }
  0x29   : > { %746 = sbr.rel (%p3103_p5) target bundleno = 48 (0x30), region = 84 }
  0x2e   : > { %v747_v0 = vld [vmem:[%s4309_s25] sm:$0xff] (!%p3103_p5)  ;;  %v748_v1 = vld [vmem:[%s4309_s25 + $0x8] sm:$0xff] (!%p3103_p5) }
  0x2f   : > { %750 = vst.msk [vmem:[#allocation2] sm:$0xff] (!%p3103_p5), %vm749_vm0, %v747_v0  ;;  %751 = vst.msk [vmem:[#allocation2 + $0x8] sm:$0xff] (!%p3103_p5), %vm749_vm0, %v748_v1 }
  0x30 PF: > { %s4310_s6 = sld [smem:[#allocation9_spill]]  ;;  %v3599_v2 = vld [vmem:[%s3850_s22] sm:$0xff]   ;;  %v3725_v3 = vmov 0.0   ;;  %v3600_v4 = vld [vmem:[%s3850_s22 + $0x8] sm:$0xff]   ;;  %vm3726_vm1 = vmmov 0   ;;  %vm780_vm2 = vcmask 261120  }
  0x31   : > { %3336 = vmatprep.subr.bf16.mxu1 %v3725_v3  ;;  %3328 = vmatprep.subr.bf16.mxu0 %v3725_v3  ;;  %v3603_v10 = vld [vmem:[%s3860_s27] sm:$0xff]   ;;  %v3604_v11 = vld [vmem:[%s3860_s27 + $0x8] sm:$0xff]   ;;  %s4311_s21 = sld [smem:[#allocation10_spill]]  ;;  %vm959_vm3 = vcmask 64512   ;;  %vm1079_vm4 = vcmask 1043456   ;;  %vm2776_vm5 = vcmask 523264  }
  0x32   : > { %3337 = vmatpush3.bf16.msra.mxu1 %v3599_v2  ;;  %3340 = vmatprep.mubr.msk.bf16.mxu1 %vm3726_vm1, %v3725_v3  ;;  %v3108_v12 = vld [vmem:[%s3855_s20] ss:$0 sm:$0xff]  ;;  %p3233_p6 = scmp.ne.s32.totalorder %s3715_s18, 5 }
  0x33   : > { %3338 = vmatprep.subr.bf16.mxu1 %v3725_v3  ;;  %3332 = vmatprep.mubr.msk.bf16.mxu0 %vm3726_vm1, %v3725_v3  ;;  %v3112_v29 = vld [vmem:[%s3865_s29] ss:$0 sm:$0xff] }
  0x36   : > { %v3601_v5 = vld [vmem:[%s4310_s6] sm:$0xff]   ;;  %v755_v7 = vld [vmem:[#allocation2 + $0x8] sm:$0xff]  ;;  %3339 = vmatpush3.bf16.msra.mxu1 %v3600_v4  ;;  %v3605_v4 = vld [vmem:[%s3850_s22 + $0x10] sm:$0xff]  }
  0x37   : > { %v754_v6 = vld [vmem:[#allocation2] sm:$0xff]  ;;  %3329 = vmatpush3.bf16.msra.mxu0 %v3601_v5  ;;  %v3602_v8 = vld [vmem:[%s4310_s6 + $0x8] sm:$0xff]   ;;  %3352 = vmatprep.subr.bf16.mxu1 %v3725_v3 }
  0x38   : > { %v3922_v9 = vpack.c.bf16 %v755_v7, %v754_v6  ;;  %3330 = vmatprep.subr.bf16.mxu0 %v3725_v3  ;;  %v3104_v17 = vld [vmem:[%s4311_s21] ss:$0 sm:$0xff] }
  0x3a   : > { %3341 = vmatmul.mubr.msk.bf16.vlgmr.msra.gmra.mrb[0].mxu1 %vm780_vm2, %v3922_v9 }
  0x3b   : > { %3331 = vmatpush3.bf16.msra.mxu0 %v3602_v8  ;;  %3354 = vmatprep.mubr.msk.bf16.mxu1 %vm3726_vm1, %v3725_v3  ;;  %v3606_v8 = vld [vmem:[%s3850_s22 + $0x18] sm:$0xff]  }
  0x3c   : > { %3344 = vmatprep.subr.bf16.mxu0 %v3725_v3 }
  0x3e   : > { %3333 = vmatmul.mubr.msk.bf16.vlgmr.msra.gmra.mrb[0].mxu0 %vm780_vm2, %v3922_v9 }
  0x3f   : > { %3345 = vmatpush3.bf16.msra.mxu0 %v3603_v10  ;;  %3348 = vmatprep.mubr.msk.bf16.mxu0 %vm3726_vm1, %v3725_v3  ;;  %v3607_v10 = vld [vmem:[%s4310_s6 + $0x10] sm:$0xff]  }
  0x40   : > { %3346 = vmatprep.subr.bf16.mxu0 %v3725_v3 }
  0x43   : > { %3347 = vmatpush3.bf16.msra.mxu0 %v3604_v11 }
  0x44   : > { %3358 = vmatprep.subr.bf16.mxu0 %v3725_v3 }
  0x46   : > { %3349 = vmatmul.mubr.msk.bf16.vlgmr.msra.gmra.mrb[4].mxu0 %vm780_vm2, %v3922_v9 }
  0x47   : > { %3360 = vmatprep.mubr.msk.bf16.mxu0 %vm3726_vm1, %v3725_v3 }
 0x10d   : > { %v882_v13 = vpop.f32.mrb[0].mxu1 }
 0x10e   : > { %v883_v14 = vadd.f32 %v3108_v12, %v882_v13  ;;  %v3342_v15 = vpop.f32.mrb[1].mxu1  ;;  %v3609_v13 = vld [vmem:[%s3860_s27 + $0x10] sm:$0xff]  }
 0x10f   : > { %v885_v16 = vpop.f32.mrb[2].mxu1 }
 0x110   : > { %v955_v19 = vpack.c.bf16 %v883_v14, %v883_v14  ;;  %v886_v20 = vadd.f32 %v3108_v12, %v885_v16  ;;  %v3343_v21 = vpop.f32.mrb[3].mxu1  ;;  %v3608_v12 = vld [vmem:[%s4310_s6 + $0x18] sm:$0xff]  }
 0x111   : > { %v818_v18 = vpop.f32.mrb[0].mxu0  ;;  %v3610_v14 = vld [vmem:[%s3860_s27 + $0x18] sm:$0xff]  }
 0x112   : > { %v3334_v22 = vpop.f32.mrb[1].mxu0  ;;  %v964_v24 = vsel %vm959_vm3, %v955_v19, 0  ;;  %v956_v25 = vpack.c.bf16 %v886_v20, %v886_v20  ;;  %v819_v26 = vadd.f32 %v3104_v17, %v818_v18 }
 0x113   : > { %v821_v23 = vpop.f32.mrb[2].mxu0  ;;  %3353 = vmatpush3.bf16.xpose.msra.mxu1 %v964_v24 }
 0x114   : > { %v3335_v27 = vpop.f32.mrb[3].mxu0  ;;  %v1010_v28 = vsel %vm959_vm3, %v956_v25, 0  ;;  %3364 = vmatprep.subr.bf16.mxu1 %v3725_v3  ;;  %v953_v30 = vpack.c.bf16 %v819_v26, %v819_v26  ;;  %v822_v31 = vadd.f32 %v3104_v17, %v821_v23  ;;  %v3134_v23 = vld [vmem:[%s3855_s20 + $0x1] ss:$0 sm:$0xff] }
 0x115   : > { %3359 = vmatpush3.bf16.xpose.msra.mxu0 %v1010_v28 }
 0x116   : > { %3370 = vmatprep.subr.bf16.mxu0 %v3725_v3  ;;  %v954_v36 = vpack.c.bf16 %v822_v31, %v822_v31 }
 0x119   : > { %v946_v32 = vpop.f32.mrb[4].mxu0 }
 0x11a   : > { %v947_v33 = vadd.f32 %v3112_v29, %v946_v32  ;;  %v3350_v34 = vpop.f32.mrb[5].mxu0  ;;  %3355 = vmatmul.mubr.msk.bf16.vlgmr.msra.gmra.mrb[4].mxu1 %vm959_vm3, %v953_v30 }
 0x11b   : > { %v949_v35 = vpop.f32.mrb[6].mxu0  ;;  %3366 = vmatprep.mubr.msk.bf16.mxu1 %vm3726_vm1, %v3725_v3 }
 0x11c   : > { %v957_v37 = vpack.c.bf16 %v947_v33, %v947_v33  ;;  %v950_v38 = vadd.f32 %v3112_v29, %v949_v35  ;;  %v3351_v39 = vpop.f32.mrb[7].mxu0  ;;  %3361 = vmatmul.mubr.msk.bf16.vlgmr.msra.gmra.mrb[8].mxu0 %vm959_vm3, %v954_v36  ;;  %v3125_v29 = vld [vmem:[%s4311_s21 + $0x1] ss:$0 sm:$0xff] }
 0x11d   : > { %3372 = vmatprep.mubr.msk.bf16.mxu0 %vm3726_vm1, %v3725_v3 }
 0x11e   : > { %v1081_v40 = vsel %vm1079_vm4, %v957_v37, 0  ;;  %v958_v41 = vpack.c.bf16 %v950_v38, %v950_v38 }
 0x11f   : > { %3365 = vmatpush3.bf16.msra.mxu1 %v1081_v40 }
 0x120   : > { %v1127_v42 = vsel %vm1079_vm4, %v958_v41, 0  ;;  %3376 = vmatprep.subr.bf16.mxu1 %v3725_v3 }
 0x121   : > { %3371 = vmatpush3.bf16.msra.mxu0 %v1127_v42 }
 0x122   : > { %3384 = vmatprep.subr.bf16.mxu0 %v3725_v3 }
 0x1ed   : > { %v1000_v43 = vpop.f32.mrb[4].mxu1 }
 0x1ee   : > { %v3356_v44 = vpop.f32.mrb[5].mxu1  ;;  %v1052_v52 = vsel %vm959_vm3, %v1000_v43, -inf }
 0x1ef   : > { %v1003_v45 = vpop.f32.mrb[6].mxu1  ;;  %v1046_v46 = vpop.f32.mrb[8].mxu0  ;;  %v3143_v44 = vld [vmem:[%s3865_s29 + $0x1] ss:$0 sm:$0xff] }
 0x1f0   : > { %v3357_v47 = vpop.f32.mrb[7].mxu1  ;;  %v3362_v48 = vpop.f32.mrb[9].mxu0  ;;  %v1055_v49 = vsel %vm959_vm3, %v1046_v46, -inf }
 0x1f1   : > { %1056 = vmax.xlane.f32.xlu0 %v1055_v49  ;;  %v1049_v50 = vpop.f32.mrb[10].mxu0 }
 0x1f2   : > { %v3363_v51 = vpop.f32.mrb[11].mxu0 }
 0x1f5   : > { %1053 = vmax.xlane.f32.xlu0 %v1052_v52 }
 0x27e   : > { %v1057_v53 = vpop.xlane.xlu0 %1056 }
 0x27f   : > { %v1059_v54 = vsub.f32 %v1046_v46, %v1057_v53 }
 0x281   : > { %v1062_v55 = vmul.f32 1.442695, %v1059_v54 }
 0x282   : > { %v1054_v56 = vpop.xlane.xlu0 %1053 }
 0x283   : > { %3629 = vpow2.f32 %v1062_v55  ;;  %v1058_v57 = vsub.f32 %v1000_v43, %v1054_v56 }
 0x285   : > { %v1060_v58 = vmul.f32 1.442695, %v1058_v57 }
 0x287   : > { %3631 = vpow2.f32 %v1060_v58 }
 0x28d   : > { %v3630_v59 = vpop.eup %3629 }
 0x28e   : > { %v1067_v60 = vsel %vm959_vm3, %v3630_v59, 0.0 }
 0x28f   : > { %1068 = vadd.xlane.f32.xlu1 %v1067_v60 }
 0x291   : > { %v3632_v61 = vpop.eup %3631 }
 0x292   : > { %v1064_v62 = vsel %vm959_vm3, %v3632_v61, 0.0 }
 0x293   : > { %1065 = vadd.xlane.f32.xlu1 %v1064_v62 }
 0x31c   : > { %v1069_v63 = vpop.xlane.xlu1 %1068 }
 0x31d   : > { %3633 = vrcp.f32 %v1069_v63 }
 0x320   : > { %v1066_v0 = vpop.xlane.xlu1 %1065 }
 0x321   : > { %3635 = vrcp.f32 %v1066_v0 }
 0x327   : > { %v3634_v1 = vpop.eup %3633 }
 0x328   : > { %v1073_v2 = vmul.f32 %v3634_v1, %v3630_v59 }
 0x32a   : > { %v1075_v5 = vpack.c.bf16 %v1073_v2, %v1073_v2 }
 0x32b   : > { %v3636_v6 = vpop.eup %3635 }
 0x32c   : > { %v1072_v7 = vmul.f32 %v3636_v6, %v3632_v61  ;;  %3373 = vmatmul.mubr.msk.bf16.vlgmr.msra.gmra.mrb[12].mxu0 %vm959_vm3, %v1075_v5 }
 0x32d   : > { %3385 = vmatpush3.bf16.msra.mxu0 %v3605_v4  ;;  %3388 = vmatprep.mubr.msk.bf16.mxu0 %vm3726_vm1, %v3725_v3 }
 0x32e   : > { %v1074_v11 = vpack.c.bf16 %v1072_v7, %v1072_v7  ;;  %3386 = vmatprep.subr.bf16.mxu0 %v3725_v3 }
 0x330   : > { %3367 = vmatmul.mubr.msk.bf16.vlgmr.msra.gmra.mrb[8].mxu1 %vm959_vm3, %v1074_v11 }
 0x331   : > { %3387 = vmatpush3.bf16.msra.mxu0 %v3606_v8  ;;  %3377 = vmatpush3.bf16.msra.mxu1 %v3607_v10 }
 0x332   : > { %3378 = vmatprep.subr.bf16.mxu1 %v3725_v3  ;;  %3380 = vmatprep.mubr.msk.bf16.mxu1 %vm3726_vm1, %v3725_v3 }
 0x333   : > { %3400 = vmatprep.subr.bf16.mxu0 %v3725_v3 }
 0x334   : > { %3389 = vmatmul.mubr.msk.bf16.vlgmr.msra.gmra.mrb[16].mxu0 %vm780_vm2, %v3922_v9 }
 0x335   : > { %3379 = vmatpush3.bf16.msra.mxu1 %v3608_v12  ;;  %3402 = vmatprep.mubr.msk.bf16.mxu0 %vm3726_vm1, %v3725_v3 }
 0x336   : > { %3392 = vmatprep.subr.bf16.mxu1 %v3725_v3 }
 0x338   : > { %3381 = vmatmul.mubr.msk.bf16.vlgmr.msra.gmra.mrb[12].mxu1 %vm780_vm2, %v3922_v9 }
 0x339   : > { %3396 = vmatprep.mubr.msk.bf16.mxu1 %vm3726_vm1, %v3725_v3  ;;  %3393 = vmatpush3.bf16.msra.mxu1 %v3609_v13 }
 0x33a   : > { %3394 = vmatprep.subr.bf16.mxu1 %v3725_v3 }
 0x33d   : > { %3395 = vmatpush3.bf16.msra.mxu1 %v3610_v14 }
 0x33e   : > { %3406 = vmatprep.subr.bf16.mxu1 %v3725_v3 }
 0x340   : > { %3397 = vmatmul.mubr.msk.bf16.vlgmr.msra.gmra.mrb[16].mxu1 %vm780_vm2, %v3922_v9 }
 0x341   : > { %3408 = vmatprep.mubr.msk.bf16.mxu1 %vm3726_vm1, %v3725_v3 }
 0x3ff   : > { %v3994_v15 = vpop.f32.mrb[12].mxu0 }
 0x400   : > { %v3374_v16 = vpop.f32.mrb[13].mxu0 }
 0x401   : > { %v1166_v17 = vpop.f32.mrb[14].mxu0 }
 0x402   : > { %v3375_v18 = vpop.f32.mrb[15].mxu0  ;;  %v3151_v17 = vld [vmem:[%s3875_s15 + $0x4] sm:$0xf] }
 0x403   : > { %v3996_v19 = vpop.f32.mrb[8].mxu1 }
 0x404   : > { %v1169_v20 = vpack.c.bf16 %v3994_v15, %v3996_v19  ;;  %v3368_v21 = vpop.f32.mrb[9].mxu1 }
 0x405   : > { %v1120_v22 = vpop.f32.mrb[10].mxu1 }
 0x406   : > { %v3369_v24 = vpop.f32.mrb[11].mxu1  ;;  %v1170_v22 = vld [vmem:[%s3875_s15] sm:$0xf] }
 0x407   : > { %v1296_v25 = vpop.f32.mrb[16].mxu0 }
 0x408   : > { %v1297_v26 = vadd.f32 %v3134_v23, %v1296_v25  ;;  %v3390_v27 = vpop.f32.mrb[17].mxu0  ;;  %v1590_v25 = vsel %vm1079_vm4, %v3151_v17, 0 }
 0x409   : > { %v1299_v28 = vpop.f32.mrb[18].mxu0  ;;  %v1637_v27 = vsel %vm1079_vm4, %v1170_v22, 0 }
 0x40a   : > { %v1371_v30 = vpack.c.bf16 %v1297_v26, %v1297_v26  ;;  %v1300_v31 = vadd.f32 %v3134_v23, %v1299_v28  ;;  %v3391_v32 = vpop.f32.mrb[19].mxu0  ;;  %v3611_v28 = vld [vmem:[%s3850_s22 + $0x20] sm:$0xff]  }
 0x40b   : > { %v1230_v33 = vpop.f32.mrb[12].mxu1 }
 0x40c   : > { %v1379_v34 = vsel %vm959_vm3, %v1371_v30, 0  ;;  %v1372_v35 = vpack.c.bf16 %v1300_v31, %v1300_v31  ;;  %v1231_v36 = vadd.f32 %v3125_v29, %v1230_v33  ;;  %v3382_v37 = vpop.f32.mrb[13].mxu1  ;;  %v3613_v31 = vld [vmem:[%s4310_s6 + $0x20] sm:$0xff]  }
 0x40d   : > { %3401 = vmatpush3.bf16.xpose.msra.mxu0 %v1379_v34  ;;  %v1233_v38 = vpop.f32.mrb[14].mxu1  ;;  %v3614_v37 = vld [vmem:[%s4310_s6 + $0x28] sm:$0xff]  }
 0x40e   : > { %v1425_v39 = vsel %vm959_vm3, %v1372_v35, 0  ;;  %v3383_v40 = vpop.f32.mrb[15].mxu1  ;;  %3412 = vmatprep.subr.bf16.mxu0 %v3725_v3  ;;  %v1369_v41 = vpack.c.bf16 %v1231_v36, %v1231_v36  ;;  %v1234_v42 = vadd.f32 %v3125_v29, %v1233_v38  ;;  %v3612_v29 = vld [vmem:[%s3850_s22 + $0x28] sm:$0xff]  }
 0x40f   : > { %3407 = vmatpush3.bf16.xpose.msra.mxu1 %v1425_v39  ;;  %v3615_v39 = vld [vmem:[%s3860_s27 + $0x20] sm:$0xff]  }
 0x410   : > { %3418 = vmatprep.subr.bf16.mxu1 %v3725_v3  ;;  %v1370_v43 = vpack.c.bf16 %v1234_v42, %v1234_v42 }
 0x413   : > { %v1362_v45 = vpop.f32.mrb[16].mxu1 }
 0x414   : > { %3403 = vmatmul.mubr.msk.bf16.vlgmr.msra.gmra.mrb[20].mxu0 %vm959_vm3, %v1369_v41  ;;  %v1363_v46 = vadd.f32 %v3143_v44, %v1362_v45  ;;  %v3398_v47 = vpop.f32.mrb[17].mxu1 }
 0x415   : > { %3414 = vmatprep.mubr.msk.bf16.mxu0 %vm3726_vm1, %v3725_v3  ;;  %v1365_v48 = vpop.f32.mrb[18].mxu1 }
 0x416   : > { %3409 = vmatmul.mubr.msk.bf16.vlgmr.msra.gmra.mrb[20].mxu1 %vm959_vm3, %v1370_v43  ;;  %v1373_v49 = vpack.c.bf16 %v1363_v46, %v1363_v46  ;;  %v1366_v50 = vadd.f32 %v3143_v44, %v1365_v48  ;;  %v3399_v51 = vpop.f32.mrb[19].mxu1  ;;  %v3616_v43 = vld [vmem:[%s3860_s27 + $0x28] sm:$0xff]   ;;  %v3168_v44 = vld [vmem:[%s3855_s20 + $0x2] ss:$0 sm:$0xff] }
 0x417   : > { %3420 = vmatprep.mubr.msk.bf16.mxu1 %vm3726_vm1, %v3725_v3 }
 0x418   : > { %v1495_v52 = vsel %vm1079_vm4, %v1373_v49, 0  ;;  %v1374_v53 = vpack.c.bf16 %v1366_v50, %v1366_v50 }
 0x419   : > { %3413 = vmatpush3.bf16.msra.mxu0 %v1495_v52 }
 0x41a   : > { %v1541_v54 = vsel %vm1079_vm4, %v1374_v53, 0  ;;  %3424 = vmatprep.subr.bf16.mxu0 %v3725_v3 }
 0x41b   : > { %3419 = vmatpush3.bf16.msra.mxu1 %v1541_v54 }
 0x41c   : > { %3430 = vmatprep.subr.bf16.mxu1 %v3725_v3 }
 0x4e7   : > { %v1415_v55 = vpop.f32.mrb[20].mxu0 }
 0x4e8   : > { %v3404_v56 = vpop.f32.mrb[21].mxu0  ;;  %v1467_v57 = vsel %vm959_vm3, %v1415_v55, -inf }
 0x4e9   : > { %v1461_v58 = vpop.f32.mrb[20].mxu1  ;;  %1468 = vmax.xlane.f32.xlu0 %v1467_v57  ;;  %v1418_v59 = vpop.f32.mrb[22].mxu0 }
 0x4ea   : > { %v3405_v60 = vpop.f32.mrb[23].mxu0  ;;  %v3410_v61 = vpop.f32.mrb[21].mxu1  ;;  %v1470_v62 = vsel %vm959_vm3, %v1461_v58, -inf }
 0x4eb   : > { %1471 = vmax.xlane.f32.xlu1 %v1470_v62  ;;  %v1464_v63 = vpop.f32.mrb[22].mxu1  ;;  %v3159_v61 = vld [vmem:[%s4311_s21 + $0x2] ss:$0 sm:$0xff] }
 0x4ec   : > { %v3411_v0 = vpop.f32.mrb[23].mxu1 }
 0x576   : > { %v1469_v1 = vpop.xlane.xlu0 %1468 }
 0x577   : > { %v1473_v2 = vsub.f32 %v1415_v55, %v1469_v1 }
 0x578   : > { %v1472_v4 = vpop.xlane.xlu1 %1471 }
 0x579   : > { %v1475_v5 = vmul.f32 1.442695, %v1473_v2  ;;  %v1474_v6 = vsub.f32 %v1461_v58, %v1472_v4 }
 0x57b   : > { %3637 = vpow2.f32 %v1475_v5  ;;  %v1477_v7 = vmul.f32 1.442695, %v1474_v6 }
 0x57d   : > { %3639 = vpow2.f32 %v1477_v7  ;;  %v3177_v7 = vld [vmem:[%s3865_s29 + $0x2] ss:$0 sm:$0xff] }
 0x585   : > { %v3638_v8 = vpop.eup %3637 }
 0x586   : > { %v1479_v10 = vsel %vm959_vm3, %v3638_v8, 0.0 }
 0x587   : > { %v3640_v11 = vpop.eup %3639  ;;  %1480 = vadd.xlane.f32.xlu0 %v1479_v10 }
 0x588   : > { %v1482_v12 = vsel %vm959_vm3, %v3640_v11, 0.0 }
 0x589   : > { %1483 = vadd.xlane.f32.xlu1 %v1482_v12 }
 0x614   : > { %v1481_v13 = vpop.xlane.xlu0 %1480 }
 0x615   : > { %3641 = vrcp.f32 %v1481_v13 }
 0x616   : > { %v1484_v14 = vpop.xlane.xlu1 %1483 }
 0x617   : > { %3643 = vrcp.f32 %v1484_v14 }
 0x61f   : > { %v3642_v16 = vpop.eup %3641 }
 0x620   : > { %v1487_v18 = vmul.f32 %v3642_v16, %v3638_v8 }
 0x621   : > { %v3644_v21 = vpop.eup %3643 }
 0x622   : > { %v1488_v23 = vmul.f32 %v3644_v21, %v3640_v11  ;;  %v1489_v24 = vpack.c.bf16 %v1487_v18, %v1487_v18 }
 0x624   : > { %3415 = vmatmul.mubr.msk.bf16.vlgmr.msra.gmra.mrb[24].mxu0 %vm959_vm3, %v1489_v24  ;;  %v1490_v26 = vpack.c.bf16 %v1488_v23, %v1488_v23 }
 0x625   : > { %3425 = vmatpush3.bf16.msra.mxu0 %v1590_v25  ;;  %3426 = vmatprep.mubr.msk.bf16.mxu0 %vm3726_vm1, %v3725_v3 }
 0x626   : > { %3421 = vmatmul.mubr.msk.bf16.vlgmr.msra.gmra.mrb[24].mxu1 %vm959_vm3, %v1490_v26  ;;  %3436 = vmatprep.subr.bf16.mxu0 %v3725_v3 }
 0x627   : > { %3431 = vmatpush3.bf16.msra.mxu1 %v1637_v27  ;;  %3432 = vmatprep.mubr.msk.bf16.mxu1 %vm3726_vm1, %v3725_v3 }
 0x628   : > { %3444 = vmatprep.subr.bf16.mxu1 %v3725_v3 }
 0x62e   : > { %3433 = vmatmul.mubr.msk.bf16.vlgmr.msra.gmra.mrb[28].mxu1 %vm959_vm3, %v1169_v20 }
 0x62f   : > { %3445 = vmatpush3.bf16.msra.mxu1 %v3611_v28  ;;  %3448 = vmatprep.mubr.msk.bf16.mxu1 %vm3726_vm1, %v3725_v3 }
 0x630   : > { %3446 = vmatprep.subr.bf16.mxu1 %v3725_v3 }
 0x633   : > { %3447 = vmatpush3.bf16.msra.mxu1 %v3612_v29 }
 0x634   : > { %3460 = vmatprep.subr.bf16.mxu1 %v3725_v3 }
 0x636   : > { %3449 = vmatmul.mubr.msk.bf16.vlgmr.msra.gmra.mrb[32].mxu1 %vm780_vm2, %v3922_v9 }
 0x637   : > { %3462 = vmatprep.mubr.msk.bf16.mxu1 %vm3726_vm1, %v3725_v3 }
 0x6f7   : > { %v1531_v15 = vpop.f32.mrb[24].mxu0 }
 0x6f8   : > { %v3416_v19 = vpop.f32.mrb[25].mxu0 }
 0x6f9   : > { %v1534_v20 = vpop.f32.mrb[26].mxu0  ;;  %v1577_v30 = vpop.f32.mrb[24].mxu1 }
 0x6fa   : > { %v1583_v32 = vpack.c.bf16 %v1577_v30, %v1531_v15  ;;  %v3417_v33 = vpop.f32.mrb[27].mxu0  ;;  %v3422_v34 = vpop.f32.mrb[25].mxu1 }
 0x6fb   : > { %v1580_v35 = vpop.f32.mrb[26].mxu1 }
 0x6fc   : > { %v3423_v36 = vpop.f32.mrb[27].mxu1  ;;  %3427 = vmatmul.mubr.msk.bf16.vlgmr.msra.gmra.mrb[28].mxu0 %vm959_vm3, %v1583_v32 }
 0x6fd   : > { %3437 = vmatpush3.bf16.msra.mxu0 %v3613_v31  ;;  %3440 = vmatprep.mubr.msk.bf16.mxu0 %vm3726_vm1, %v3725_v3 }
 0x6fe   : > { %3438 = vmatprep.subr.bf16.mxu0 %v3725_v3 }
 0x701   : > { %v1673_v38 = vpop.f32.mrb[28].mxu1  ;;  %3439 = vmatpush3.bf16.msra.mxu0 %v3614_v37 }
 0x702   : > { %v3434_v40 = vpop.f32.mrb[29].mxu1  ;;  %3452 = vmatprep.subr.bf16.mxu0 %v3725_v3 }
 0x703   : > { %v1676_v41 = vpop.f32.mrb[30].mxu1 }
 0x704   : > { %v3435_v42 = vpop.f32.mrb[31].mxu1  ;;  %3441 = vmatmul.mubr.msk.bf16.vlgmr.msra.gmra.mrb[32].mxu0 %vm780_vm2, %v3922_v9 }
 0x705   : > { %3453 = vmatpush3.bf16.msra.mxu0 %v3615_v39  ;;  %3456 = vmatprep.mubr.msk.bf16.mxu0 %vm3726_vm1, %v3725_v3  ;;  %v3185_v42 = vld [vmem:[%s3875_s15 + $0x8] sm:$0xf] }
 0x706   : > { %3454 = vmatprep.subr.bf16.mxu0 %v3725_v3 }
 0x709   : > { %v1805_v45 = vpop.f32.mrb[32].mxu1  ;;  %3455 = vmatpush3.bf16.msra.mxu0 %v3616_v43 }
 0x70a   : > { %v1806_v46 = vadd.f32 %v3168_v44, %v1805_v45  ;;  %v3450_v47 = vpop.f32.mrb[33].mxu1  ;;  %3466 = vmatprep.subr.bf16.mxu0 %v3725_v3 }
 0x70b   : > { %v1808_v48 = vpop.f32.mrb[34].mxu1  ;;  %v2099_v47 = vsel %vm1079_vm4, %v3185_v42, 0 }
 0x70c   : > { %v1880_v49 = vpack.c.bf16 %v1806_v46, %v1806_v46  ;;  %v1809_v50 = vadd.f32 %v3168_v44, %v1808_v48  ;;  %v3451_v51 = vpop.f32.mrb[35].mxu1  ;;  %3457 = vmatmul.mubr.msk.bf16.vlgmr.msra.gmra.mrb[36].mxu0 %vm780_vm2, %v3922_v9 }
 0x70d   : > { %3468 = vmatprep.mubr.msk.bf16.mxu0 %vm3726_vm1, %v3725_v3 }
 0x70e   : > { %v1888_v52 = vsel %vm959_vm3, %v1880_v49, 0  ;;  %v1881_v53 = vpack.c.bf16 %v1809_v50, %v1809_v50  ;;  %v3619_v49 = vld [vmem:[%s4310_s6 + $0x30] sm:$0xff]   ;;  %v3620_v50 = vld [vmem:[%s4310_s6 + $0x38] sm:$0xff]  }
 0x70f   : > { %3461 = vmatpush3.bf16.xpose.msra.mxu1 %v1888_v52 }
 0x710   : > { %v1934_v54 = vsel %vm959_vm3, %v1881_v53, 0  ;;  %3472 = vmatprep.subr.bf16.mxu1 %v3725_v3 }
 0x712   : > { %3467 = vmatpush3.bf16.xpose.msra.mxu0 %v1934_v54 }
 0x713   : > { %3478 = vmatprep.subr.bf16.mxu0 %v3725_v3 }
 0x7cf   : > { %v1626_v55 = vpop.f32.mrb[28].mxu0 }
 0x7d0   : > { %v4071_v56 = vadd.f32 %v1673_v38, %v1626_v55  ;;  %v3428_v57 = vpop.f32.mrb[29].mxu0  ;;  %v3617_v55 = vld [vmem:[%s3850_s22 + $0x30] sm:$0xff]  }
 0x7d1   : > { %v1629_v58 = vpop.f32.mrb[30].mxu0 }
 0x7d2   : > { %v4073_v59 = vadd.f32 %v1676_v41, %v1629_v58  ;;  %v3429_v60 = vpop.f32.mrb[31].mxu0 }
 0x7d7   : > { %v1739_v62 = vpop.f32.mrb[32].mxu0 }
 0x7d8   : > { %v1740_v63 = vadd.f32 %v3159_v61, %v1739_v62  ;;  %v3442_v0 = vpop.f32.mrb[33].mxu0 }
 0x7d9   : > { %v1742_v1 = vpop.f32.mrb[34].mxu0  ;;  %v3621_v0 = vld [vmem:[%s3860_s27 + $0x30] sm:$0xff]  }
 0x7da   : > { %v1878_v2 = vpack.c.bf16 %v1740_v63, %v1740_v63  ;;  %v1743_v4 = vadd.f32 %v3159_v61, %v1742_v1  ;;  %v3443_v5 = vpop.f32.mrb[35].mxu0  ;;  %v3618_v63 = vld [vmem:[%s3850_s22 + $0x38] sm:$0xff]  }
 0x7db   : > { %v3622_v1 = vld [vmem:[%s3860_s27 + $0x38] sm:$0xff]   ;;  %s4312_s27 = scalar_lea.vmem %s4274_s8, %s3833_s23 }
 0x7dc   : > { %v1879_v6 = vpack.c.bf16 %v1743_v4, %v1743_v4  ;;  %3463 = vmatmul.mubr.msk.bf16.vlgmr.msra.gmra.mrb[36].mxu1 %vm959_vm3, %v1878_v2 }
 0x7dd   : > { %3474 = vmatprep.mubr.msk.bf16.mxu1 %vm3726_vm1, %v3725_v3 }
 0x7de   : > { %3469 = vmatmul.mubr.msk.bf16.vlgmr.msra.gmra.mrb[40].mxu0 %vm959_vm3, %v1879_v6 }
 0x7df   : > { %v1871_v8 = vpop.f32.mrb[36].mxu0  ;;  %3480 = vmatprep.mubr.msk.bf16.mxu0 %vm3726_vm1, %v3725_v3 }
 0x7e0   : > { %v1872_v10 = vadd.f32 %v3177_v7, %v1871_v8  ;;  %v3458_v11 = vpop.f32.mrb[37].mxu0 }
 0x7e1   : > { %v1874_v12 = vpop.f32.mrb[38].mxu0 }
 0x7e2   : > { %v1882_v13 = vpack.c.bf16 %v1872_v10, %v1872_v10  ;;  %v1875_v14 = vadd.f32 %v3177_v7, %v1874_v12  ;;  %v3459_v16 = vpop.f32.mrb[39].mxu0 }
 0x7e4   : > { %v2004_v17 = vsel %vm1079_vm4, %v1882_v13, 0  ;;  %v1883_v18 = vpack.c.bf16 %v1875_v14, %v1875_v14  ;;  %v3201_v14 = vld [vmem:[%s3855_s20 + $0x3] ss:$0 sm:$0xff] }
 0x7e5   : > { %3473 = vmatpush3.bf16.msra.mxu1 %v2004_v17 }
 0x7e6   : > { %v2050_v21 = vsel %vm1079_vm4, %v1883_v18, 0  ;;  %3484 = vmatprep.subr.bf16.mxu1 %v3725_v3 }
 0x7e7   : > { %3479 = vmatpush3.bf16.msra.mxu0 %v2050_v21  ;;  %v3192_v21 = vld [vmem:[%s4311_s21 + $0x3] ss:$0 sm:$0xff] }
 0x7e8   : > { %3490 = vmatprep.subr.bf16.mxu0 %v3725_v3 }
 0x8af   : > { %v1924_v22 = vpop.f32.mrb[36].mxu1 }
 0x8b0   : > { %v3464_v23 = vpop.f32.mrb[37].mxu1  ;;  %v1976_v24 = vsel %vm959_vm3, %v1924_v22, -inf }
 0x8b1   : > { %1977 = vmax.xlane.f32.xlu0 %v1976_v24  ;;  %v1927_v25 = vpop.f32.mrb[38].mxu1  ;;  %v1970_v26 = vpop.f32.mrb[40].mxu0 }
 0x8b2   : > { %v3465_v27 = vpop.f32.mrb[39].mxu1  ;;  %v3470_v28 = vpop.f32.mrb[41].mxu0  ;;  %v1979_v29 = vsel %vm959_vm3, %v1970_v26, -inf }
 0x8b3   : > { %1980 = vmax.xlane.f32.xlu1 %v1979_v29  ;;  %v1973_v15 = vpop.f32.mrb[42].mxu0 }
 0x8b4   : > { %v3471_v19 = vpop.f32.mrb[43].mxu0  ;;  %v3210_v15 = vld [vmem:[%s3865_s29 + $0x3] ss:$0 sm:$0xff] }
 0x93e   : > { %v1978_v20 = vpop.xlane.xlu0 %1977 }
 0x93f   : > { %v1982_v30 = vsub.f32 %v1924_v22, %v1978_v20 }
 0x940   : > { %v1981_v31 = vpop.xlane.xlu1 %1980 }
 0x941   : > { %v1984_v32 = vmul.f32 1.442695, %v1982_v30  ;;  %v1983_v33 = vsub.f32 %v1970_v26, %v1981_v31 }
 0x943   : > { %3645 = vpow2.f32 %v1984_v32  ;;  %v1986_v34 = vmul.f32 1.442695, %v1983_v33 }
 0x945   : > { %3647 = vpow2.f32 %v1986_v34 }
 0x94d   : > { %v3646_v35 = vpop.eup %3645 }
 0x94e   : > { %v1988_v36 = vsel %vm959_vm3, %v3646_v35, 0.0 }
 0x94f   : > { %v3648_v37 = vpop.eup %3647  ;;  %1989 = vadd.xlane.f32.xlu0 %v1988_v36 }
 0x950   : > { %v1991_v38 = vsel %vm959_vm3, %v3648_v37, 0.0 }
 0x951   : > { %1992 = vadd.xlane.f32.xlu1 %v1991_v38 }
 0x9dc   : > { %v1990_v39 = vpop.xlane.xlu0 %1989 }
 0x9dd   : > { %3649 = vrcp.f32 %v1990_v39 }
 0x9de   : > { %v1993_v40 = vpop.xlane.xlu1 %1992 }
 0x9df   : > { %3651 = vrcp.f32 %v1993_v40 }
 0x9e7   : > { %v3650_v41 = vpop.eup %3649 }
 0x9e8   : > { %v1996_v43 = vmul.f32 %v3650_v41, %v3646_v35 }
 0x9e9   : > { %v3652_v44 = vpop.eup %3651 }
 0x9ea   : > { %v1997_v45 = vmul.f32 %v3652_v44, %v3648_v37  ;;  %v1998_v46 = vpack.c.bf16 %v1996_v43, %v1996_v43 }
 0x9ec   : > { %3475 = vmatmul.mubr.msk.bf16.vlgmr.msra.gmra.mrb[40].mxu1 %vm959_vm3, %v1998_v46  ;;  %v1999_v48 = vpack.c.bf16 %v1997_v45, %v1997_v45 }
 0x9ed   : > { %3485 = vmatpush3.bf16.msra.mxu1 %v2099_v47  ;;  %3486 = vmatprep.mubr.msk.bf16.mxu1 %vm3726_vm1, %v3725_v3 }
 0x9ee   : > { %3481 = vmatmul.mubr.msk.bf16.vlgmr.msra.gmra.mrb[44].mxu0 %vm959_vm3, %v1999_v48  ;;  %3498 = vmatprep.subr.bf16.mxu1 %v3725_v3 }
 0x9ef   : > { %3494 = vmatprep.mubr.msk.bf16.mxu0 %vm3726_vm1, %v3725_v3  ;;  %3491 = vmatpush3.bf16.msra.mxu0 %v3619_v49 }
 0x9f0   : > { %3492 = vmatprep.subr.bf16.mxu0 %v3725_v3 }
 0x9f3   : > { %3493 = vmatpush3.bf16.msra.mxu0 %v3620_v50 }
 0x9f4   : > { %3506 = vmatprep.subr.bf16.mxu0 %v3725_v3 }
 0x9f6   : > { %3495 = vmatmul.mubr.msk.bf16.vlgmr.msra.gmra.mrb[48].mxu0 %vm780_vm2, %v3922_v9 }
 0x9f7   : > { %3510 = vmatprep.mubr.msk.bf16.mxu0 %vm3726_vm1, %v3725_v3  ;;  %3507 = vmatpush3.bf16.msra.mxu0 %v3621_v0 }
 0x9f8   : > { %3508 = vmatprep.subr.bf16.mxu0 %v3725_v3 }
 0x9fb   : > { %3509 = vmatpush3.bf16.msra.mxu0 %v3622_v1 }
 0x9fc   : > { %3520 = vmatprep.subr.bf16.mxu0 %v3725_v3 }
 0x9fe   : > { %3511 = vmatmul.mubr.msk.bf16.vlgmr.msra.gmra.mrb[52].mxu0 %vm780_vm2, %v3922_v9 }
 0x9ff   : > { %3522 = vmatprep.mubr.msk.bf16.mxu0 %vm3726_vm1, %v3725_v3 }
 0xabf   : > { %v2040_v51 = vpop.f32.mrb[40].mxu1 }
 0xac0   : > { %v3476_v52 = vpop.f32.mrb[41].mxu1 }
 0xac1   : > { %v2043_v53 = vpop.f32.mrb[42].mxu1  ;;  %v2086_v54 = vpop.f32.mrb[44].mxu0 }
 0xac2   : > { %v2092_v57 = vpack.c.bf16 %v2086_v54, %v2040_v51  ;;  %v3477_v58 = vpop.f32.mrb[43].mxu1  ;;  %v3482_v60 = vpop.f32.mrb[45].mxu0 }
 0xac3   : > { %v2089_v61 = vpop.f32.mrb[46].mxu0 }
 0xac4   : > { %v3483_v62 = vpop.f32.mrb[47].mxu0  ;;  %3487 = vmatmul.mubr.msk.bf16.vlgmr.msra.gmra.mrb[44].mxu1 %vm959_vm3, %v2092_v57 }
 0xac5   : > { %3499 = vmatpush3.bf16.msra.mxu1 %v3617_v55  ;;  %3502 = vmatprep.mubr.msk.bf16.mxu1 %vm3726_vm1, %v3725_v3 }
 0xac6   : > { %3500 = vmatprep.subr.bf16.mxu1 %v3725_v3 }
 0xac9   : > { %3501 = vmatpush3.bf16.msra.mxu1 %v3618_v63  ;;  %v2203_v2 = vpop.f32.mrb[48].mxu0  ;;  %v3218_v63 = vld [vmem:[%s3875_s15 + $0xc] sm:$0xf] }
 0xaca   : > { %3514 = vmatprep.subr.bf16.mxu1 %v3725_v3  ;;  %v3496_v4 = vpop.f32.mrb[49].mxu0  ;;  %v2204_v26 = vadd.f32 %v3192_v21, %v2203_v2 }
 0xacb   : > { %v2206_v5 = vpop.f32.mrb[50].mxu0 }
 0xacc   : > { %3503 = vmatmul.mubr.msk.bf16.vlgmr.msra.gmra.mrb[48].mxu1 %vm780_vm2, %v3922_v9  ;;  %v3497_v6 = vpop.f32.mrb[51].mxu0  ;;  %v2207_v28 = vadd.f32 %v3192_v21, %v2206_v5  ;;  %v2563_v5 = vsel %vm1079_vm4, %v3218_v63, 0 }
 0xacd   : > { %3516 = vmatprep.mubr.msk.bf16.mxu1 %vm3726_vm1, %v3725_v3 }
 0xace   : > { %v2343_v29 = vpack.c.bf16 %v2207_v28, %v2207_v28 }
 0xad1   : > { %v2335_v19 = vpop.f32.mrb[52].mxu0 }
 0xad2   : > { %v2336_v20 = vadd.f32 %v3210_v15, %v2335_v19  ;;  %v3512_v30 = vpop.f32.mrb[53].mxu0 }
 0xad3   : > { %v2338_v31 = vpop.f32.mrb[54].mxu0 }
 0xad4   : > { %v2346_v32 = vpack.c.bf16 %v2336_v20, %v2336_v20  ;;  %v2339_v33 = vadd.f32 %v3210_v15, %v2338_v31  ;;  %v3513_v34 = vpop.f32.mrb[55].mxu0  ;;  %v3670_v15 = vld [vmem:[#allocation2 + $0x8] sm:$0xff] }
 0xad5   : > { %v3624_v34 = vld [vmem:[%s3888_s5 + $0x8] sm:$0xff]  }
 0xad6   : > { %v2468_v35 = vsel %vm1079_vm4, %v2346_v32, 0  ;;  %v2347_v36 = vpack.c.bf16 %v2339_v33, %v2339_v33  ;;  %v3623_v33 = vld [vmem:[%s3888_s5] sm:$0xff]  }
 0xad8   : > { %v2514_v37 = vsel %vm1079_vm4, %v2347_v36, 0  ;;  %v3626_v36 = vld [vmem:[%s3898_s7 + $0x8] sm:$0xff]  }
 0xb97   : > { %v2135_v7 = vpop.f32.mrb[44].mxu1 }
 0xb98   : > { %v4128_v8 = vadd.f32 %v2135_v7, %v4071_v56  ;;  %v3488_v10 = vpop.f32.mrb[45].mxu1 }
 0xb99   : > { %v2138_v11 = vpop.f32.mrb[46].mxu1 }
 0xb9a   : > { %v4131_v12 = vadd.f32 %v2138_v11, %v4073_v59  ;;  %v3489_v13 = vpop.f32.mrb[47].mxu1  ;;  %v2342_v59 = vpack.c.bf16 %v2204_v26, %v2204_v26 }
 0xb9f   : > { %v2269_v9 = vpop.f32.mrb[48].mxu1 }
 0xba0   : > { %v2270_v16 = vadd.f32 %v3201_v14, %v2269_v9  ;;  %v3504_v17 = vpop.f32.mrb[49].mxu1 }
 0xba1   : > { %v2272_v18 = vpop.f32.mrb[50].mxu1 }
 0xba2   : > { %v2344_v22 = vpack.c.bf16 %v2270_v16, %v2270_v16  ;;  %v2273_v23 = vadd.f32 %v3201_v14, %v2272_v18  ;;  %v3505_v24 = vpop.f32.mrb[51].mxu1 }
 0xba4   : > { %v2352_v25 = vsel %vm959_vm3, %v2344_v22, 0  ;;  %v2345_v56 = vpack.c.bf16 %v2273_v23, %v2273_v23  ;;  %v3220_v22 = vld [vmem:[%s4312_s27] ss:$0 sm:$0xff] }
 0xba5   : > { %3515 = vmatpush3.bf16.xpose.msra.mxu1 %v2352_v25 }
 0xba6   : > { %v2398_v27 = vsel %vm959_vm3, %v2345_v56, 0  ;;  %3526 = vmatprep.subr.bf16.mxu1 %v3725_v3 }
 0xba7   : > { %3521 = vmatpush3.bf16.xpose.msra.mxu0 %v2398_v27 }
 0xba8   : > { %3532 = vmatprep.subr.bf16.mxu0 %v3725_v3 }
 0xbac   : > { %3517 = vmatmul.mubr.msk.bf16.vlgmr.msra.gmra.mrb[52].mxu1 %vm959_vm3, %v2342_v59  ;;  %v3669_v59 = vld [vmem:[#allocation2] sm:$0xff] }
 0xbad   : > { %3528 = vmatprep.mubr.msk.bf16.mxu1 %vm3726_vm1, %v3725_v3  ;;  %3527 = vmatpush3.bf16.msra.mxu1 %v2468_v35  ;;  %v3625_v35 = vld [vmem:[%s3898_s7] sm:$0xff]  }
 0xbae   : > { %3523 = vmatmul.mubr.msk.bf16.vlgmr.msra.gmra.mrb[56].mxu0 %vm959_vm3, %v2343_v29  ;;  %3538 = vmatprep.subr.bf16.mxu1 %v3725_v3 }
 0xbaf   : > { %3534 = vmatprep.mubr.msk.bf16.mxu0 %vm3726_vm1, %v3725_v3  ;;  %3533 = vmatpush3.bf16.msra.mxu0 %v2514_v37 }
 0xbb0   : > { %3544 = vmatprep.subr.bf16.mxu0 %v3725_v3 }
 0xc7f   : > { %v2388_v38 = vpop.f32.mrb[52].mxu1 }
 0xc80   : > { %v3518_v39 = vpop.f32.mrb[53].mxu1  ;;  %v2440_v40 = vsel %vm959_vm3, %v2388_v38, -inf }
 0xc81   : > { %2441 = vmax.xlane.f32.xlu0 %v2440_v40  ;;  %v2391_v41 = vpop.f32.mrb[54].mxu1  ;;  %v2434_v42 = vpop.f32.mrb[56].mxu0 }
 0xc82   : > { %v3519_v43 = vpop.f32.mrb[55].mxu1  ;;  %v3524_v44 = vpop.f32.mrb[57].mxu0  ;;  %v2443_v45 = vsel %vm959_vm3, %v2434_v42, -inf }
 0xc83   : > { %2444 = vmax.xlane.f32.xlu1 %v2443_v45  ;;  %v2437_v46 = vpop.f32.mrb[58].mxu0 }
 0xc84   : > { %v3525_v47 = vpop.f32.mrb[59].mxu0 }
 0xd0e   : > { %v2442_v48 = vpop.xlane.xlu0 %2441 }
 0xd0f   : > { %v2446_v49 = vsub.f32 %v2388_v38, %v2442_v48 }
 0xd10   : > { %v2445_v50 = vpop.xlane.xlu1 %2444 }
 0xd11   : > { %v2448_v51 = vmul.f32 1.442695, %v2446_v49  ;;  %v2447_v52 = vsub.f32 %v2434_v42, %v2445_v50 }
 0xd13   : > { %3653 = vpow2.f32 %v2448_v51  ;;  %v2450_v53 = vmul.f32 1.442695, %v2447_v52 }
 0xd15   : > { %3655 = vpow2.f32 %v2450_v53  ;;  %v4189_v53 = vld [vmem:[%s721_s0] ss:$0 sm:$0xff] }
 0xd1d   : > { %v3654_v54 = vpop.eup %3653 }
 0xd1e   : > { %v2452_v55 = vsel %vm959_vm3, %v3654_v54, 0.0 }
 0xd1f   : > { %v3656_v57 = vpop.eup %3655  ;;  %2453 = vadd.xlane.f32.xlu0 %v2452_v55 }
 0xd20   : > { %v2455_v58 = vsel %vm959_vm3, %v3656_v57, 0.0 }
 0xd21   : > { %2456 = vadd.xlane.f32.xlu1 %v2455_v58 }
 0xdac   : > { %v2454_v60 = vpop.xlane.xlu0 %2453 }
 0xdad   : > { %3657 = vrcp.f32 %v2454_v60 }
 0xdae   : > { %v2457_v61 = vpop.xlane.xlu1 %2456 }
 0xdaf   : > { %3659 = vrcp.f32 %v2457_v61  ;;  %v4197_v61 = vld [vmem:[%s724_s1] ss:$0 sm:$0xff] }
 0xdb7   : > { %v3658_v62 = vpop.eup %3657 }
 0xdb8   : > { %v2460_v0 = vmul.f32 %v3658_v62, %v3654_v54 }
 0xdb9   : > { %v3660_v1 = vpop.eup %3659 }
 0xdba   : > { %v2461_v2 = vmul.f32 %v3660_v1, %v3656_v57  ;;  %v2462_v4 = vpack.c.bf16 %v2460_v0, %v2460_v0 }
 0xdbc   : > { %3529 = vmatmul.mubr.msk.bf16.vlgmr.msra.gmra.mrb[56].mxu1 %vm959_vm3, %v2462_v4  ;;  %v2463_v6 = vpack.c.bf16 %v2461_v2, %v2461_v2  ;;  %v3627_v2 = vld [vmem:[%s3898_s7 + $0x10] sm:$0xff]   ;;  %v3628_v4 = vld [vmem:[%s3898_s7 + $0x18] sm:$0xff]  }
 0xdbd   : > { %3539 = vmatpush3.bf16.msra.mxu1 %v2563_v5  ;;  %3540 = vmatprep.mubr.msk.bf16.mxu1 %vm3726_vm1, %v3725_v3  ;;  %v3223_v5 = vld [vmem:[%s732_s17] ss:$0 sm:$0xff] }
 0xdbe   : > { %3535 = vmatmul.mubr.msk.bf16.vlgmr.msra.gmra.mrb[60].mxu0 %vm959_vm3, %v2463_v6  ;;  %3552 = vmatprep.subr.bf16.mxu1 %v3725_v3 }
 0xdbf   : > { %3548 = vmatprep.mubr.msk.bf16.mxu0 %vm3726_vm1, %v3725_v3  ;;  %3545 = vmatpush3.bf16.msra.mxu0 %v3623_v33 }
 0xdc0   : > { %3546 = vmatprep.subr.bf16.mxu0 %v3725_v3 }
 0xdc3   : > { %3547 = vmatpush3.bf16.msra.mxu0 %v3624_v34 }
 0xe8f   : > { %v2504_v7 = vpop.f32.mrb[56].mxu1 }
 0xe90   : > { %v3530_v10 = vpop.f32.mrb[57].mxu1 }
 0xe91   : > { %v2507_v11 = vpop.f32.mrb[58].mxu1  ;;  %v2550_v13 = vpop.f32.mrb[60].mxu0 }
 0xe92   : > { %v2556_v14 = vpack.c.bf16 %v2550_v13, %v2504_v7  ;;  %v3531_v9 = vpop.f32.mrb[59].mxu1  ;;  %v3536_v16 = vpop.f32.mrb[61].mxu0 }
 0xe93   : > { %v2553_v17 = vpop.f32.mrb[62].mxu0 }
 0xe94   : > { %v3537_v18 = vpop.f32.mrb[63].mxu0  ;;  %3541 = vmatmul.mubr.msk.bf16.vlgmr.msra.gmra.mrb[60].mxu1 %vm959_vm3, %v2556_v14 }
 0xe95   : > { %3560 = vmatprep.mubr.msk.bf16.mxu1 %vm3726_vm1, %v3725_v3  ;;  %3553 = vmatpush3.bf16.msra.mxu1 %v3625_v35 }
 0xe96   : > { %3554 = vmatprep.subr.bf16.mxu1 %v3725_v3 }
 0xe99   : > { %3555 = vmatpush3.bf16.msra.mxu1 %v3626_v36 }
 0xe9a   : > { %3556 = vmatprep.subr.bf16.mxu1 %v3725_v3 }
 0xe9d   : > { %3557 = vmatpush3.bf16.msra.mxu1 %v3627_v2 }
 0xe9e   : > { %3558 = vmatprep.subr.bf16.mxu1 %v3725_v3  ;;  %v3227_v3 = vld [vmem:[%s740_s24] ss:$0 sm:$0xff] }
 0xea1   : > { %3559 = vmatpush3.bf16.msra.mxu1 %v3628_v4 }
 0xf67   : > { %v2599_v21 = vpop.f32.mrb[60].mxu1 }
 0xf68   : > { %v2606_v23 = vadd.f32 %v2599_v21, %v4128_v8  ;;  %v3542_v24 = vpop.f32.mrb[61].mxu1 }
 0xf69   : > { %v2602_v25 = vpop.f32.mrb[62].mxu1 }
 0xf6a   : > { %v2615_v56 = vadd.f32 %v3220_v22, %v2606_v23  ;;  %v2607_v26 = vadd.f32 %v2602_v25, %v4131_v12  ;;  %v3543_v27 = vpop.f32.mrb[63].mxu1 }
 0xf6c   : > { %v2617_v28 = vadd.f32 %v3669_v59, %v2615_v56  ;;  %v2616_v29 = vadd.f32 %v3220_v22, %v2607_v26 }
 0xf6e   : > { %v2618_v19 = vadd.f32 %v3670_v15, %v2616_v29  ;;  %v2619_v20 = vsel %vm780_vm2, %v2617_v28, 0.0  ;;  %v2628_v30 = vmul.f32 %v2617_v28, %v2617_v28 }
 0xf6f   : > { %2620 = vadd.xlane.f32.xlu0 %v2619_v20 }
 0xf70   : > { %v2622_v8 = vsel %vm780_vm2, %v2618_v19, 0.0  ;;  %v2629_v31 = vmul.f32 %v2618_v19, %v2618_v19  ;;  %v2630_v12 = vsel %vm780_vm2, %v2628_v30, 0.0 }
 0xf71   : > { %2623 = vadd.xlane.f32.xlu1 %v2622_v8 }
 0xf72   : > { %v2633_v32 = vsel %vm780_vm2, %v2629_v31, 0.0 }
 0xf73   : > { %2631 = vadd.xlane.f32.xlu0 %v2630_v12 }
 0xf75   : > { %2634 = vadd.xlane.f32.xlu1 %v2633_v32 }
 0xffc   : > { %v2621_v37 = vpop.xlane.xlu0 %2620 }
 0xffd   : > { %v2626_v38 = vmul.f32 0.03125, %v2621_v37 }
 0xffe   : > { %v2624_v39 = vpop.xlane.xlu1 %2623 }
 0xfff   : > { %v2627_v40 = vmul.f32 0.03125, %v2624_v39  ;;  %v2638_v42 = vmul.f32 %v2626_v38, %v2626_v38  ;;  %v2642_v51 = vsub.f32 %v2617_v28, %v2626_v38 }
0x1000   : > { %v2632_v41 = vpop.xlane.xlu0 %2631 }
0x1001   : > { %v2636_v43 = vmul.f32 0.03125, %v2632_v41  ;;  %v2639_v45 = vmul.f32 %v2627_v40, %v2627_v40  ;;  %v2643_v54 = vsub.f32 %v2618_v19, %v2627_v40 }
0x1002   : > { %v2635_v44 = vpop.xlane.xlu1 %2634 }
0x1003   : > { %v2640_v46 = vsub.f32 %v2636_v43, %v2638_v42  ;;  %v2637_v47 = vmul.f32 0.03125, %v2635_v44 }
0x1005   : > { %v2644_v48 = vadd.f32 1e-05, %v2640_v46  ;;  %v2641_v49 = vsub.f32 %v2637_v47, %v2639_v45 }
0x1007   : > { %3661 = vrsqrt.f32 %v2644_v48  ;;  %v2645_v50 = vadd.f32 1e-05, %v2641_v49 }
0x1009   : > { %3663 = vrsqrt.f32 %v2645_v50 }
0x1011   : > { %v3662_v52 = vpop.eup %3661 }
0x1012   : > { %v2648_v55 = vmul.f32 %v3662_v52, %v2642_v51 }
0x1013   : > { %v3664_v57 = vpop.eup %3663 }
0x1014   : > { %v2649_v58 = vmul.f32 %v3664_v57, %v2643_v54  ;;  %v2656_v60 = vmul.f32 %v4189_v53, %v2648_v55 }
0x1016   : > { %v2657_v62 = vmul.f32 %v4189_v53, %v2649_v58  ;;  %v2664_v63 = vadd.f32 %v4197_v61, %v2656_v60 }
0x1018   : > { %v2665_v0 = vadd.f32 %v4197_v61, %v2657_v62 }
0x101a   : > { %v2666_v1 = vpack.c.bf16 %v2665_v0, %v2664_v63 }
0x101c   : > { %3549 = vmatmul.mubr.msk.bf16.vlgmr.msra.gmra.mrb[64].mxu0 %vm780_vm2, %v2666_v1 }
0x10ef   : > { %v2727_v6 = vpop.f32.mrb[64].mxu0 }
0x10f0   : > { %v2728_v7 = vadd.f32 %v3223_v5, %v2727_v6  ;;  %v3550_v10 = vpop.f32.mrb[65].mxu0 }
0x10f1   : > { %v2730_v11 = vpop.f32.mrb[66].mxu0 }
0x10f2   : > { %v2731_v13 = vadd.f32 %v3223_v5, %v2730_v11  ;;  %v3551_v14 = vpop.f32.mrb[67].mxu0  ;;  %v2734_v9 = vmax.f32 %v2728_v7, 0.0 }
0x10f4   : > { %v2735_v16 = vmax.f32 %v2731_v13, 0.0 }
0x10f6   : > { %v2736_v17 = vpack.c.bf16 %v2735_v16, %v2734_v9 }
0x10f8   : > { %3561 = vmatmul.mubr.msk.bf16.vlgmr.msra.gmra.mrb[64].mxu1 %vm2776_vm5, %v2736_v17 }
0x11cb   : > { %v2814_v18 = vpop.f32.mrb[64].mxu1 }
0x11cc   : > { %v2815_v21 = vadd.f32 %v3227_v3, %v2814_v18  ;;  %v3562_v22 = vpop.f32.mrb[65].mxu1 }
0x11cd   : > { %v2817_v23 = vpop.f32.mrb[66].mxu1 }
0x11ce   : > { %v2821_v24 = vadd.f32 %v2815_v21, %v2664_v63  ;;  %v2818_v25 = vadd.f32 %v3227_v3, %v2817_v23  ;;  %v3563_v56 = vpop.f32.mrb[67].mxu1 }
0x11d0   : > { %v2822_v26 = vadd.f32 %v2818_v25, %v2665_v0  ;;  %v2823_v27 = vsel %vm780_vm2, %v2821_v24, 0.0  ;;  %v2831_v59 = vmul.f32 %v2821_v24, %v2821_v24 }
0x11d1   : > { %2824 = vadd.xlane.f32.xlu0 %v2823_v27 }
0x11d2   : > { %v2826_v28 = vsel %vm780_vm2, %v2822_v26, 0.0  ;;  %v2832_v29 = vmul.f32 %v2822_v26, %v2822_v26  ;;  %v2833_v15 = vsel %vm780_vm2, %v2831_v59, 0.0 }
0x11d3   : > { %2827 = vadd.xlane.f32.xlu1 %v2826_v28 }
0x11d4   : > { %v2836_v19 = vsel %vm780_vm2, %v2832_v29, 0.0 }
0x11d5   : > { %2834 = vadd.xlane.f32.xlu0 %v2833_v15 }
0x11d7   : > { %2837 = vadd.xlane.f32.xlu1 %v2836_v19 }
0x125e   : > { %v2825_v20 = vpop.xlane.xlu0 %2824 }
0x125f   : > { %v2829_v30 = vmul.f32 0.03125, %v2825_v20 }
0x1260   : > { %v2828_v8 = vpop.xlane.xlu1 %2827 }
0x1261   : > { %v2830_v31 = vmul.f32 0.03125, %v2828_v8  ;;  %v2841_v32 = vmul.f32 %v2829_v30, %v2829_v30  ;;  %v2845_v41 = vsub.f32 %v2821_v24, %v2829_v30 }
0x1262   : > { %v2835_v12 = vpop.xlane.xlu0 %2834 }
0x1263   : > { %v2839_v33 = vmul.f32 0.03125, %v2835_v12  ;;  %v2842_v35 = vmul.f32 %v2830_v31, %v2830_v31  ;;  %v2846_v43 = vsub.f32 %v2822_v26, %v2830_v31 }
0x1264   : > { %v2838_v34 = vpop.xlane.xlu1 %2837 }
0x1265   : > { %v2843_v36 = vsub.f32 %v2839_v33, %v2841_v32  ;;  %v2840_v37 = vmul.f32 0.03125, %v2838_v34 }
0x1267   : > { %v2847_v38 = vadd.f32 1e-05, %v2843_v36  ;;  %v2844_v39 = vsub.f32 %v2840_v37, %v2842_v35 }
0x1269   : > { %3665 = vrsqrt.f32 %v2847_v38  ;;  %v2848_v40 = vadd.f32 1e-05, %v2844_v39 }
0x126b   : > { %3667 = vrsqrt.f32 %v2848_v40 }
0x1273   : > { %v3666_v42 = vpop.eup %3665 }
0x1274   : > { %v2851_v44 = vmul.f32 %v3666_v42, %v2845_v41 }
0x1275   : > { %v3668_v45 = vpop.eup %3667 }
0x1276   : > { %v2853_v46 = vmul.f32 %v4189_v53, %v2851_v44  ;;  %v2852_v47 = vmul.f32 %v3668_v45, %v2846_v43  ;;  %2862 = sbr.rel (%p3233_p6) target bundleno = 4733 (0x127d), region = 88 }
0x1278   : > { %v2855_v48 = vadd.f32 %v4197_v61, %v2853_v46  ;;  %v2854_v49 = vmul.f32 %v4189_v53, %v2852_v47 }
0x127a   : > { %2857 = vst.msk [vmem:[#allocation2] sm:$0xff] %vm780_vm2, %v2855_v48  ;;  %v2856_v50 = vadd.f32 %v4197_v61, %v2854_v49  ;;  %2863 = vst.msk [vmem:[#allocation3] sm:$0xff] (!%p3233_p6), %vm780_vm2, %v2855_v48 }
0x127c   : > { %2858 = vst.msk [vmem:[#allocation2 + $0x8] sm:$0xff] %vm780_vm2, %v2856_v50  ;;  %2864 = vst.msk [vmem:[#allocation3 + $0x8] sm:$0xff] (!%p3233_p6), %vm780_vm2, %v2856_v50 }
0x127d PF: > { %s4313_s7 = sld [smem:[#allocation7_spill]]  ;;  %s3727_s19 = smov [#allocation3]  }
0x127e   : > { %s2874_s24 = sshll.u32 %s3727_s19, 4  ;;  %s2875_s24 = int_to_ptr.vmem [resolvable:$true] %s2874_s24 }
0x127f   : > { %s3671_s26 = scalar_lea.vmem %s2875_s24, 256  ;;  %p3678_p11 = scmp.lt.s32.totalorder %s2875_s24, %s2875_s24 }
0x1280   : > { %p3672_p8 = scmp.ne.s32.totalorder %s2875_s24, %s3671_s26  ;;  %p3679_p12 = scmp.lt.s32.totalorder %s3671_s26, %s3671_s26 }
0x1282   : > { %p3680_p13 = por %p3679_p12, %p3678_p11 }
0x1283   : > { %s4314_s23 = sadd.s32 4294967295, %s4313_s7  }
0x1284   : > { %p4231_p7 = scmp.eq.s32.totalorder %s4314_s23, 5 }
0x1286   : > { %p3673_p9 = pnand %p3672_p8, %p4231_p7 }
0x1288   : > { %p3674_p10 = pneg %p3673_p9 }
0x128a   : > { %p3681_p0 = pnand %p3680_p13, %p3674_p10 }
0x128c   : > { %3684 = shalt.err (!%p3681_p0)
}
0x128d   : > { %s4316_s28 = sld [smem:[#allocation19_spill]] }
0x1293   : > { %s3685_s2 = scalar_lea.hbm %s4316_s28, 256 }
0x1294   : > { %p3686_p1 = scmp.ne.s32.totalorder %s4316_s28, %s3685_s2  ;;  %p3691_p4 = scmp.lt.u32.totalorder %s3685_s2, %s4316_s28 }
0x1296   : > { %p3687_p2 = pnand %p3686_p1, %p4231_p7 }
0x1298   : > { %p3688_p3 = pneg %p3687_p2 }
0x129a   : > { %p3693_p5 = pnand %p3691_p4, %p3688_p3 }
0x129c   : > { %3696 = shalt.err (!%p3693_p5)
}
0x129d   : > { %s3728_s27 = smov 128   ;;  %s3729_s5 = smov 8  }
0x129e   : > { %3565 = dma.vmem_to_hbm [thread:$0]  (%p4231_p7), %s2875_s24, 256, %s4316_s28, [#allocation4], %s3728_s27, %s3728_s27, %s3729_s5  }
0x129f   : > { %3710 = dma.done.wait (%p4231_p7), [#allocation4], 256  }
0x12a0   : > { %3712 = vsyncadd (%p4231_p7), [#allocation4], 4294967040 }
0x12a1 PF: > { %s4317_s3 = sld [smem:[#allocation7_spill]]  ;;  %s4318_s18 = sld [smem:[#allocation6_spill]] }
0x12a2   : > { %s4319_s19 = sld [smem:[#allocation8_spill]] }
0x12a7   : > { %s26_s20 = sadd.s32 1, %s4317_s3  }
0x12a8   : > { %p23_p6 = scmp.ge.s32.totalorder %s26_s20, 8  }
0x12aa   :  { %25 = sbr.rel (!%p23_p6) target bundleno = 12 (0xc), region = 179 }
0x12b1   :  { %2890 = vsyncpa [#allocation4], 1 }
0x12b2   :  { %2892 = vsyncpa [#allocation4 + $0x1], 1 }

</bundles_post_ra>
